<compile_context>
chip_gen: v5e
topology: v5e:2x2
jax: 0.10.0
libtpu: 0.0.40
codegen_flags: <defaults>
</compile_context>

<pallas_src>
import jax
import jax.numpy as jnp
from jax.experimental import pallas as pl
from jax.experimental.pallas import tpu as pltpu


def _round_up(x, m):
    return (x + m - 1) // m * m


# -----------------------------------------------------------------------------
# Pallas kernel: fused two-tower MLP + dot-product logits + masked BCE per-ex loss
# -----------------------------------------------------------------------------
def _make_kernel(true_b, tb, compute_dtype):
    def kernel(
        q_ref, c_ref,            # (TB, Dp)   bf16 pooled embeddings (one batch tile)
        labels_ref,              # (1, 1, TB) f32 labels, lane-dense
        w1q_ref, b1q_ref,        # (Dp, H1p) bf16, (1, H1p) f32
        w2q_ref, b2q_ref,        # (H1p, H2p) bf16, (1, H2p) f32
        w1c_ref, b1c_ref,
        w2c_ref, b2c_ref,
        out_ref,                 # (1, 2, TB) f32: row 0 = logits, row 1 = masked BCE
    ):
        def tower(x_ref, w1_ref, b1_ref, w2_ref, b2_ref):
            h1 = jnp.dot(x_ref[...], w1_ref[...],
                         preferred_element_type=jnp.float32) + b1_ref[...]
            h1 = jnp.maximum(h1, 0.0)
            h2 = jnp.dot(h1.astype(compute_dtype), w2_ref[...],
                         preferred_element_type=jnp.float32) + b2_ref[...]
            return jnp.maximum(h2, 0.0)                      # (TB, H2p) f32

        q_emb = tower(q_ref, w1q_ref, b1q_ref, w2q_ref, b2q_ref)
        c_emb = tower(c_ref, w1c_ref, b1c_ref, w2c_ref, b2c_ref)

        # logits_i = sum_k q_emb[i,k] * c_emb[i,k]; transpose once (XLU) so the batch
        # dim lands on lanes -> lane-dense (1, TB) rows.  (Kept: likely hidden under
        # MXU slack; revisit only if bundle profiling shows it on the critical path.)
        prod_t = jnp.transpose(q_emb * c_emb)                # (H2p, TB)
        logits_row = jnp.sum(prod_t, axis=0, keepdims=True)  # (1, TB)

        # BCEWithLogits per example (numerically stable), padded rows masked to 0.
        y = labels_ref[0]                                    # (1, TB)
        x = logits_row
        per_ex = jnp.maximum(x, 0.0) - x * y + jnp.log1p(jnp.exp(-jnp.abs(x)))
        col = jax.lax.broadcasted_iota(jnp.int32, (1, tb), 1)
        valid = (pl.program_id(0) * tb + col) < true_b
        loss_row = jnp.where(valid, per_ex, 0.0)

        # Single merged lane-dense store: row 0 logits, row 1 masked per-example BCE.
        out_ref[0, :, :] = jnp.concatenate([logits_row, loss_row], axis=0)

    return kernel


# -----------------------------------------------------------------------------
# One-time parameter preparation (hoisted out of the per-step path)
# -----------------------------------------------------------------------------
def prepare_params(params, compute_dtype=jnp.bfloat16):
    """Pad feature dims to 128-lane multiples and cast matmul operands to bf16, ONCE."""
    (w1q, b1q, w2q, b2q, w1c, b1c, w2c, b2c) = params
    D, H1 = w1q.shape
    H2 = w2q.shape[1]
    Dp, H1p, H2p = _round_up(D, 128), _round_up(H1, 128), _round_up(H2, 128)

    def pad2(x, r, c, dtype):
        return jnp.zeros((r, c), dtype).at[: x.shape[0], : x.shape[1]].set(
            x.astype(dtype))

    padded = (
        pad2(w1q, Dp, H1p, compute_dtype), pad2(b1q, 1, H1p, jnp.float32),
        pad2(w2q, H1p, H2p, compute_dtype), pad2(b2q, 1, H2p, jnp.float32),
        pad2(w1c, Dp, H1p, compute_dtype), pad2(b1c, 1, H1p, jnp.float32),
        pad2(w2c, H1p, H2p, compute_dtype), pad2(b2c, 1, H2p, jnp.float32),
    )
    dims = dict(D=D, H1=H1, H2=H2, Dp=Dp, H1p=H1p, H2p=H2p)
    return padded, dims, compute_dtype


# -----------------------------------------------------------------------------
# Wrapper: tile sizing, activation padding, BlockSpecs, grid, final tiny reduction
# -----------------------------------------------------------------------------
def two_tower_train_task(q_pooled, c_pooled, labels, prepared, *, tb=512):
    """Fused Pallas two-tower forward. Returns (loss, (loss, logits, labels))."""
    padded_w, dims, compute_dtype = prepared
    B, D = q_pooled.shape
    assert D == dims["D"], "pooled embedding dim mismatch with prepared params"
    Dp, H1p, H2p = dims["Dp"], dims["H1p"], dims["H2p"]

    # --- tile sizing: big tiles amortize ~0.35us/step grid overhead and fill the MXU
    # rows (M>=256 on v6e/v7x), but keep G >= 2 when the batch allows it so the
    # "parallel" axis can shard across v7x's 2 TensorCores.
    Bmin = _round_up(max(B, 1), 128)
    tb_eff = min(_round_up(tb, 128), Bmin)
    if Bmin // tb_eff < 2 and Bmin >= 256:
        tb_eff = max(128, _round_up(Bmin // 2, 128))
    Bp = _round_up(max(B, 1), tb_eff)
    G = Bp // tb_eff

    # --- activation padding (skipped entirely when already aligned) ---------------
    def pad_act(x):
        if x.shape == (Bp, Dp) and x.dtype == compute_dtype:
            return x
        return (jnp.zeros((Bp, Dp), compute_dtype)
                .at[: x.shape[0], : x.shape[1]].set(x.astype(compute_dtype)))

    q_pad = pad_act(q_pooled)
    c_pad = pad_act(c_pooled)

    labels_f = labels.astype(jnp.float32)
    labels_pad = (jnp.zeros((Bp,), jnp.float32)
                  .at[:B].set(labels_f)
                  .reshape(G, 1, tb_eff))                  # lane-dense labels

    kernel = _make_kernel(true_b=B, tb=tb_eff, compute_dtype=compute_dtype)

    # --- cost & VMEM budget --------------------------------------------------------
    wbytes = jnp.dtype(compute_dtype).itemsize
    flops = 4 * Bp * (Dp * H1p + H1p * H2p) + 8 * Bp * H2p
    bytes_accessed = (
        2 * Bp * Dp * wbytes                       # q/c tiles
        + Bp * 4                                   # labels
        + 2 * (Dp * H1p + H1p * H2p) * wbytes      # weights (both towers)
        + 2 * (H1p + H2p) * 4                      # biases
        + 2 * Bp * 4                               # logits + per-ex loss
    )
    weight_bytes = 2 * (Dp * H1p + H1p * H2p) * wbytes + 2 * (H1p + H2p) * 4
    stream_bytes = (2 * 2 * tb_eff * Dp * wbytes   # q/c, double-buffered
                    + 2 * 1 * tb_eff * 4           # labels, double-buffered
                    + 2 * 2 * tb_eff * 4)          # merged output, double-buffered
    inter_bytes = tb_eff * (2 * H1p + 4 * H2p + 8) * 4   # f32 h1/h2/prod headroom
    vmem_needed = 2 * weight_bytes + stream_bytes + inter_bytes   # worst case (2x weights)
    # >= 32 MiB (beats the 16/32 MiB scoped defaults), capped at 56 MiB (v7x-safe).
    vmem_limit = int(min(max(32 << 20, int(1.5 * vmem_needed) + (4 << 20)), 56 << 20))

    # --- specs / pallas_call -------------------------------------------------------
    tile_map = lambda i: (i, 0)      # batch-tiled q/c
    lab_map = lambda i: (i, 0, 0)    # lane-dense labels
    const_map = lambda i: (0, 0)     # weights/biases stay resident (never re-DMA'd)
    out_map = lambda i: (i, 0, 0)    # merged (1, 2, TB) output slab

    def build(single_buffer_weights):
        def wspec(shape):
            if single_buffer_weights:
                # Constant-index blocks never re-DMA; one buffer is enough (saves VMEM,
                # matters most on v7x's 64 MiB).
                return pl.BlockSpec(shape, const_map, pipeline_mode=pl.Buffered(1))
            return pl.BlockSpec(shape, const_map)

        in_specs = [
            pl.BlockSpec((tb_eff, Dp), tile_map),      # q_pooled tile
            pl.BlockSpec((tb_eff, Dp), tile_map),      # c_pooled tile
            pl.BlockSpec((1, 1, tb_eff), lab_map),     # labels (lane-dense)
            wspec((Dp, H1p)), wspec((1, H1p)),         # w1q, b1q
            wspec((H1p, H2p)), wspec((1, H2p)),        # w2q, b2q
            wspec((Dp, H1p)), wspec((1, H1p)),         # w1c, b1c
            wspec((H1p, H2p)), wspec((1, H2p)),        # w2c, b2c
        ]
        out_specs = pl.BlockSpec((1, 2, tb_eff), out_map)

        return pl.pallas_call(
            kernel,
            out_shape=jax.ShapeDtypeStruct((G, 2, tb_eff), jnp.float32),
            grid_spec=pltpu.PrefetchScalarGridSpec(
                num_scalar_prefetch=0,
                grid=(G,),
                in_specs=in_specs,
                out_specs=out_specs,
            ),
            compiler_params=pltpu.CompilerParams(
                dimension_semantics=("parallel",),     # batch axis is truly parallel
                vmem_limit_bytes=vmem_limit,
            ),
            cost_estimate=pl.CostEstimate(
                flops=int(flops),
                transcendentals=int(2 * Bp),
                bytes_accessed=int(bytes_accessed),
            ),
        )

    args = (q_pad, c_pad, labels_pad, *padded_w)
    try:
        out = build(single_buffer_weights=True)(*args)
    except Exception:
        # Older Pallas without pipeline_mode / Buffered(1) support: default buffering.
        out = build(single_buffer_weights=False)(*args)

    logits = out[:, 0, :].reshape(Bp)[:B]        # matches torch .sum(dim=1).squeeze()
    loss = jnp.sum(out[:, 1, :]) / max(B, 1)     # global mean over the TRUE batch
    return loss, (loss, logits, labels_f)


# -----------------------------------------------------------------------------
# Glue: embedding-bag sum pooling (the EmbeddingBagCollection part)
# -----------------------------------------------------------------------------
def pool_embeddings(table, ids):
    # ids: (B, L) int32 -> sum-pooled (B, D)
    return jnp.sum(table[ids], axis=1)


# -----------------------------------------------------------------------------
# Pure-JAX reference (same bf16 matmul operands, f32 elementwise) for sanity check
# -----------------------------------------------------------------------------
def reference(q_pooled, c_pooled, labels, params, compute_dtype=jnp.bfloat16):
    (w1q, b1q, w2q, b2q, w1c, b1c, w2c, b2c) = params

    def mm(a, w):
        return jnp.dot(a.astype(compute_dtype), w.astype(compute_dtype),
                       preferred_element_type=jnp.float32)

    def tower(x, w1, b1, w2, b2):
        h = jnp.maximum(mm(x, w1) + b1, 0.0)
        return jnp.maximum(mm(h, w2) + b2, 0.0)

    q_emb = tower(q_pooled, w1q, b1q, w2q, b2q)
    c_emb = tower(c_pooled, w1c, b1c, w2c, b2c)
    logits = jnp.sum(q_emb * c_emb, axis=1)
    y = labels.astype(jnp.float32)
    per_ex = jnp.maximum(logits, 0.0) - logits * y + jnp.log1p(jnp.exp(-jnp.abs(logits)))
    return jnp.mean(per_ex), logits


if __name__ == "__main__":
    # Small, forward-consistent shapes.
    B = 8            # batch
    D = 32           # embedding_dim (shared by both embedding bags)
    H1, H2 = 32, 16  # layer_sizes of each tower MLP
    NUM_EMB_Q, NUM_EMB_C = 50, 60
    L = 4            # ids per sample per feature (fixed-length "jagged" bag)

    key = jax.random.PRNGKey(0)
    keys = jax.random.split(key, 12)

    # Embedding tables (EmbeddingBagCollection with two bags).
    table_q = jax.random.normal(keys[0], (NUM_EMB_Q, D), jnp.float32) * 0.1
    table_c = jax.random.normal(keys[1], (NUM_EMB_C, D), jnp.float32) * 0.1

    # Sparse features (KeyedJaggedTensor stand-in: fixed L ids per sample).
    ids_q = jax.random.randint(keys[2], (B, L), 0, NUM_EMB_Q)
    ids_c = jax.random.randint(keys[3], (B, L), 0, NUM_EMB_C)
    labels = jax.random.bernoulli(keys[4], 0.5, (B,)).astype(jnp.float32)

    # Tower MLP parameters (Linear weights stored as (in, out); bias as (1, out)).
    def init_linear(k, fan_in, fan_out):
        kw, kb = jax.random.split(k)
        w = jax.random.normal(kw, (fan_in, fan_out), jnp.float32) * 0.05
        b = jax.random.normal(kb, (1, fan_out), jnp.float32) * 0.05
        return w, b

    w1q, b1q = init_linear(keys[5], D, H1)
    w2q, b2q = init_linear(keys[6], H1, H2)
    w1c, b1c = init_linear(keys[7], D, H1)
    w2c, b2c = init_linear(keys[8], H1, H2)
    params = (w1q, b1q, w2q, b2q, w1c, b1c, w2c, b2c)

    # EmbeddingBag sum pooling (glue, outside the kernel).
    q_pooled = pool_embeddings(table_q, ids_q)   # (B, D)
    c_pooled = pool_embeddings(table_c, ids_c)   # (B, D)

    # One-time parameter prep (padding + bf16 cast hoisted out of the step path).
    prepared = prepare_params(params)

    # Run the fused Pallas kernel.
    loss, (loss_detached, logits, labels_out) = two_tower_train_task(
        q_pooled, c_pooled, labels, prepared
    )
    jax.block_until_ready((loss, logits, labels_out))

    # Sanity check against the pure-JAX reference (same bf16 matmul operands).
    ref_loss, ref_logits = reference(q_pooled, c_pooled, labels, params)
    assert logits.shape == (B,)
    assert jnp.allclose(logits, ref_logits, atol=1e-3, rtol=1e-3), "logits mismatch"
    assert jnp.allclose(loss, ref_loss, atol=1e-3, rtol=1e-3), "loss mismatch"

    print("KERNEL_OK")
</pallas_src>

<mosaic_0001>
module attributes {stable_mosaic.version = 11 : i64} {
  func.func @kernel(%arg0: i32, %arg1: memref<128x128xbf16, #tpu.memory_space<vmem>>, %arg2: memref<128x128xbf16, #tpu.memory_space<vmem>>, %arg3: memref<1x1x128xf32, #tpu.memory_space<vmem>>, %arg4: memref<128x128xbf16, #tpu.memory_space<vmem>>, %arg5: memref<1x128xf32, #tpu.memory_space<vmem>>, %arg6: memref<128x128xbf16, #tpu.memory_space<vmem>>, %arg7: memref<1x128xf32, #tpu.memory_space<vmem>>, %arg8: memref<128x128xbf16, #tpu.memory_space<vmem>>, %arg9: memref<1x128xf32, #tpu.memory_space<vmem>>, %arg10: memref<128x128xbf16, #tpu.memory_space<vmem>>, %arg11: memref<1x128xf32, #tpu.memory_space<vmem>>, %arg12: memref<1x2x128xf32, #tpu.memory_space<vmem>>) attributes {dimension_semantics = [#tpu.dimension_semantics<parallel>], iteration_bounds = array<i64: 1>, scalar_prefetch = 0 : i64, scratch_operands = 0 : i64, tpu.core_type = #tpu.core_type<tc>, window_params = [{transform_indices = @transform_0, window_bounds = array<i64: 128, 128>}, {transform_indices = @transform_1, window_bounds = array<i64: 128, 128>}, {transform_indices = @transform_2, window_bounds = array<i64: 1, 1, 128>}, {pipeline_mode = #tpu.pipeline_mode<synchronous>, transform_indices = @transform_3, window_bounds = array<i64: 128, 128>}, {pipeline_mode = #tpu.pipeline_mode<synchronous>, transform_indices = @transform_4, window_bounds = array<i64: 1, 128>}, {pipeline_mode = #tpu.pipeline_mode<synchronous>, transform_indices = @transform_5, window_bounds = array<i64: 128, 128>}, {pipeline_mode = #tpu.pipeline_mode<synchronous>, transform_indices = @transform_6, window_bounds = array<i64: 1, 128>}, {pipeline_mode = #tpu.pipeline_mode<synchronous>, transform_indices = @transform_7, window_bounds = array<i64: 128, 128>}, {pipeline_mode = #tpu.pipeline_mode<synchronous>, transform_indices = @transform_8, window_bounds = array<i64: 1, 128>}, {pipeline_mode = #tpu.pipeline_mode<synchronous>, transform_indices = @transform_9, window_bounds = array<i64: 128, 128>}, {pipeline_mode = #tpu.pipeline_mode<synchronous>, transform_indices = @transform_10, window_bounds = array<i64: 1, 128>}, {transform_indices = @transform_11, window_bounds = array<i64: 1, 2, 128>}]} {
    %c0 = arith.constant 0 : index
    %c0_0 = arith.constant 0 : index
    %0 = vector.load %arg1[%c0, %c0_0] : memref<128x128xbf16, #tpu.memory_space<vmem>>, vector<128x128xbf16>
    %c0_1 = arith.constant 0 : index
    %c0_2 = arith.constant 0 : index
    %1 = vector.load %arg4[%c0_1, %c0_2] : memref<128x128xbf16, #tpu.memory_space<vmem>>, vector<128x128xbf16>
    %cst = arith.constant dense<0.000000e+00> : vector<128x128xf32>
    %2 = tpu.matmul %0, %1, %cst {dimension_numbers = #tpu.dot_dimension_numbers<[1], [0], [0], [1], [0, 0, 1, 1], [], []>} : vector<128x128xbf16>, vector<128x128xbf16>, vector<128x128xf32> -> vector<128x128xf32>
    %c0_3 = arith.constant 0 : index
    %c0_4 = arith.constant 0 : index
    %3 = vector.load %arg5[%c0_3, %c0_4] : memref<1x128xf32, #tpu.memory_space<vmem>>, vector<1x128xf32>
    %4 = vector.broadcast %3 : vector<1x128xf32> to vector<128x128xf32>
    %5 = arith.addf %2, %4 : vector<128x128xf32>
    %cst_5 = arith.constant 0.000000e+00 : f32
    %6 = vector.broadcast %cst_5 : f32 to vector<128x128xf32>
    %7 = arith.maximumf %5, %6 : vector<128x128xf32>
    %8 = arith.truncf %7 : vector<128x128xf32> to vector<128x128xbf16>
    %c0_6 = arith.constant 0 : index
    %c0_7 = arith.constant 0 : index
    %9 = vector.load %arg6[%c0_6, %c0_7] : memref<128x128xbf16, #tpu.memory_space<vmem>>, vector<128x128xbf16>
    %cst_8 = arith.constant dense<0.000000e+00> : vector<128x128xf32>
    %10 = tpu.matmul %8, %9, %cst_8 {dimension_numbers = #tpu.dot_dimension_numbers<[1], [0], [0], [1], [0, 0, 1, 1], [], []>} : vector<128x128xbf16>, vector<128x128xbf16>, vector<128x128xf32> -> vector<128x128xf32>
    %c0_9 = arith.constant 0 : index
    %c0_10 = arith.constant 0 : index
    %11 = vector.load %arg7[%c0_9, %c0_10] : memref<1x128xf32, #tpu.memory_space<vmem>>, vector<1x128xf32>
    %12 = vector.broadcast %11 : vector<1x128xf32> to vector<128x128xf32>
    %13 = arith.addf %10, %12 : vector<128x128xf32>
    %cst_11 = arith.constant 0.000000e+00 : f32
    %14 = vector.broadcast %cst_11 : f32 to vector<128x128xf32>
    %15 = arith.maximumf %13, %14 : vector<128x128xf32>
    %c0_12 = arith.constant 0 : index
    %c0_13 = arith.constant 0 : index
    %16 = vector.load %arg2[%c0_12, %c0_13] : memref<128x128xbf16, #tpu.memory_space<vmem>>, vector<128x128xbf16>
    %c0_14 = arith.constant 0 : index
    %c0_15 = arith.constant 0 : index
    %17 = vector.load %arg8[%c0_14, %c0_15] : memref<128x128xbf16, #tpu.memory_space<vmem>>, vector<128x128xbf16>
    %cst_16 = arith.constant dense<0.000000e+00> : vector<128x128xf32>
    %18 = tpu.matmul %16, %17, %cst_16 {dimension_numbers = #tpu.dot_dimension_numbers<[1], [0], [0], [1], [0, 0, 1, 1], [], []>} : vector<128x128xbf16>, vector<128x128xbf16>, vector<128x128xf32> -> vector<128x128xf32>
    %c0_17 = arith.constant 0 : index
    %c0_18 = arith.constant 0 : index
    %19 = vector.load %arg9[%c0_17, %c0_18] : memref<1x128xf32, #tpu.memory_space<vmem>>, vector<1x128xf32>
    %20 = vector.broadcast %19 : vector<1x128xf32> to vector<128x128xf32>
    %21 = arith.addf %18, %20 : vector<128x128xf32>
    %cst_19 = arith.constant 0.000000e+00 : f32
    %22 = vector.broadcast %cst_19 : f32 to vector<128x128xf32>
    %23 = arith.maximumf %21, %22 : vector<128x128xf32>
    %24 = arith.truncf %23 : vector<128x128xf32> to vector<128x128xbf16>
    %c0_20 = arith.constant 0 : index
    %c0_21 = arith.constant 0 : index
    %25 = vector.load %arg10[%c0_20, %c0_21] : memref<128x128xbf16, #tpu.memory_space<vmem>>, vector<128x128xbf16>
    %cst_22 = arith.constant dense<0.000000e+00> : vector<128x128xf32>
    %26 = tpu.matmul %24, %25, %cst_22 {dimension_numbers = #tpu.dot_dimension_numbers<[1], [0], [0], [1], [0, 0, 1, 1], [], []>} : vector<128x128xbf16>, vector<128x128xbf16>, vector<128x128xf32> -> vector<128x128xf32>
    %c0_23 = arith.constant 0 : index
    %c0_24 = arith.constant 0 : index
    %27 = vector.load %arg11[%c0_23, %c0_24] : memref<1x128xf32, #tpu.memory_space<vmem>>, vector<1x128xf32>
    %28 = vector.broadcast %27 : vector<1x128xf32> to vector<128x128xf32>
    %29 = arith.addf %26, %28 : vector<128x128xf32>
    %cst_25 = arith.constant 0.000000e+00 : f32
    %30 = vector.broadcast %cst_25 : f32 to vector<128x128xf32>
    %31 = arith.maximumf %29, %30 : vector<128x128xf32>
    %32 = arith.mulf %15, %31 : vector<128x128xf32>
    %33 = tpu.transpose %32, [1, 0] : vector<128x128xf32> -> vector<128x128xf32>
    %cst_26 = arith.constant dense<0.000000e+00> : vector<128xf32>
    %34 = vector.multi_reduction <add>, %33, %cst_26 [0] : vector<128x128xf32> to vector<128xf32>
    %35 = vector.shape_cast %34 : vector<128xf32> to vector<1x128xf32>
    %c0_27 = arith.constant 0 : index
    %c0_28 = arith.constant 0 : index
    %c0_29 = arith.constant 0 : index
    %36 = vector.load %arg3[%c0_27, %c0_28, %c0_29] : memref<1x1x128xf32, #tpu.memory_space<vmem>>, vector<1x1x128xf32>
    %37 = vector.shape_cast %36 : vector<1x1x128xf32> to vector<1x128xf32>
    %cst_30 = arith.constant 0.000000e+00 : f32
    %38 = vector.broadcast %cst_30 : f32 to vector<1x128xf32>
    %39 = arith.maximumf %35, %38 : vector<1x128xf32>
    %40 = arith.mulf %35, %37 : vector<1x128xf32>
    %41 = arith.subf %39, %40 : vector<1x128xf32>
    %42 = math.absf %35 : vector<1x128xf32>
    %cst_31 = arith.constant 0.000000e+00 : f32
    %43 = vector.broadcast %cst_31 : f32 to vector<1x128xf32>
    %44 = arith.subf %43, %42 : vector<1x128xf32>
    %45 = math.exp %44 : vector<1x128xf32>
    %46 = math.log1p %45 : vector<1x128xf32>
    %47 = arith.addf %41, %46 : vector<1x128xf32>
    %48 = tpu.iota {dimensions = array<i32: 1>} : vector<1x128xi32>
    %c128_i32 = arith.constant 128 : i32
    %49 = arith.muli %arg0, %c128_i32 : i32
    %50 = vector.broadcast %49 : i32 to vector<1x128xi32>
    %51 = arith.addi %50, %48 : vector<1x128xi32>
    %c8_i32 = arith.constant 8 : i32
    %52 = vector.broadcast %c8_i32 : i32 to vector<1x128xi32>
    %53 = arith.cmpi slt, %51, %52 : vector<1x128xi32>
    %cst_32 = arith.constant 0.000000e+00 : f32
    %54 = vector.broadcast %cst_32 : f32 to vector<1x128xf32>
    %55 = arith.select %53, %47, %54 : vector<1x128xi1>, vector<1x128xf32>
    %56 = tpu.concatenate %35, %55 in 0 : vector<1x128xf32>, vector<1x128xf32> -> vector<2x128xf32>
    %c0_33 = arith.constant 0 : index
    %c0_34 = arith.constant 0 : index
    %c0_35 = arith.constant 0 : index
    %57 = vector.load %arg12[%c0_33, %c0_34, %c0_35] : memref<1x2x128xf32, #tpu.memory_space<vmem>>, vector<1x2x128xf32>
    %58 = vector.shape_cast %57 : vector<1x2x128xf32> to vector<2x128xf32>
    %59 = vector.shape_cast %56 : vector<2x128xf32> to vector<1x2x128xf32>
    tpu.vector_store %arg12[%c0_33, %c0_34, %c0_35], %59 {strides = array<i32>} : memref<1x2x128xf32, #tpu.memory_space<vmem>>, vector<1x2x128xf32>,
    return
  }
  func.func @transform_0(%arg0: i32) -> (i32, i32) {
    %c0_i32 = arith.constant 0 : i32
    %c0_i32_0 = arith.constant 0 : i32
    return %arg0, %c0_i32 : i32, i32
  }
  func.func @transform_1(%arg0: i32) -> (i32, i32) {
    %c0_i32 = arith.constant 0 : i32
    %c0_i32_0 = arith.constant 0 : i32
    return %arg0, %c0_i32 : i32, i32
  }
  func.func @transform_2(%arg0: i32) -> (i32, i32, i32) {
    %c0_i32 = arith.constant 0 : i32
    %c0_i32_0 = arith.constant 0 : i32
    %c0_i32_1 = arith.constant 0 : i32
    return %arg0, %c0_i32, %c0_i32_0 : i32, i32, i32
  }
  func.func @transform_3(%arg0: i32) -> (i32, i32) {
    %c0_i32 = arith.constant 0 : i32
    %c0_i32_0 = arith.constant 0 : i32
    %c0_i32_1 = arith.constant 0 : i32
    return %c0_i32, %c0_i32_0 : i32, i32
  }
  func.func @transform_4(%arg0: i32) -> (i32, i32) {
    %c0_i32 = arith.constant 0 : i32
    %c0_i32_0 = arith.constant 0 : i32
    %c0_i32_1 = arith.constant 0 : i32
    return %c0_i32, %c0_i32_0 : i32, i32
  }
  func.func @transform_5(%arg0: i32) -> (i32, i32) {
    %c0_i32 = arith.constant 0 : i32
    %c0_i32_0 = arith.constant 0 : i32
    %c0_i32_1 = arith.constant 0 : i32
    return %c0_i32, %c0_i32_0 : i32, i32
  }
  func.func @transform_6(%arg0: i32) -> (i32, i32) {
    %c0_i32 = arith.constant 0 : i32
    %c0_i32_0 = arith.constant 0 : i32
    %c0_i32_1 = arith.constant 0 : i32
    return %c0_i32, %c0_i32_0 : i32, i32
  }
  func.func @transform_7(%arg0: i32) -> (i32, i32) {
    %c0_i32 = arith.constant 0 : i32
    %c0_i32_0 = arith.constant 0 : i32
    %c0_i32_1 = arith.constant 0 : i32
    return %c0_i32, %c0_i32_0 : i32, i32
  }
  func.func @transform_8(%arg0: i32) -> (i32, i32) {
    %c0_i32 = arith.constant 0 : i32
    %c0_i32_0 = arith.constant 0 : i32
    %c0_i32_1 = arith.constant 0 : i32
    return %c0_i32, %c0_i32_0 : i32, i32
  }
  func.func @transform_9(%arg0: i32) -> (i32, i32) {
    %c0_i32 = arith.constant 0 : i32
    %c0_i32_0 = arith.constant 0 : i32
    %c0_i32_1 = arith.constant 0 : i32
    return %c0_i32, %c0_i32_0 : i32, i32
  }
  func.func @transform_10(%arg0: i32) -> (i32, i32) {
    %c0_i32 = arith.constant 0 : i32
    %c0_i32_0 = arith.constant 0 : i32
    %c0_i32_1 = arith.constant 0 : i32
    return %c0_i32, %c0_i32_0 : i32, i32
  }
  func.func @transform_11(%arg0: i32) -> (i32, i32, i32) {
    %c0_i32 = arith.constant 0 : i32
    %c0_i32_0 = arith.constant 0 : i32
    %c0_i32_1 = arith.constant 0 : i32
    return %arg0, %c0_i32, %c0_i32_0 : i32, i32, i32
  }
}

module attributes {stable_mosaic.version = 11 : i64} {
  func.func @kernel(%arg0: i32, %arg1: memref<128x128xbf16, #tpu.memory_space<vmem>>, %arg2: memref<128x128xbf16, #tpu.memory_space<vmem>>, %arg3: memref<1x1x128xf32, #tpu.memory_space<vmem>>, %arg4: memref<128x128xbf16, #tpu.memory_space<vmem>>, %arg5: memref<1x128xf32, #tpu.memory_space<vmem>>, %arg6: memref<128x128xbf16, #tpu.memory_space<vmem>>, %arg7: memref<1x128xf32, #tpu.memory_space<vmem>>, %arg8: memref<128x128xbf16, #tpu.memory_space<vmem>>, %arg9: memref<1x128xf32, #tpu.memory_space<vmem>>, %arg10: memref<128x128xbf16, #tpu.memory_space<vmem>>, %arg11: memref<1x128xf32, #tpu.memory_space<vmem>>, %arg12: memref<1x2x128xf32, #tpu.memory_space<vmem>>) attributes {dimension_semantics = [#tpu.dimension_semantics<parallel>], iteration_bounds = array<i64: 1>, scalar_prefetch = 0 : i64, scratch_operands = 0 : i64, tpu.core_type = #tpu.core_type<tc>, window_params = [{transform_indices = @transform_0, window_bounds = array<i64: 128, 128>}, {transform_indices = @transform_1, window_bounds = array<i64: 128, 128>}, {transform_indices = @transform_2, window_bounds = array<i64: 1, 1, 128>}, {pipeline_mode = #tpu.pipeline_mode<synchronous>, transform_indices = @transform_3, window_bounds = array<i64: 128, 128>}, {pipeline_mode = #tpu.pipeline_mode<synchronous>, transform_indices = @transform_4, window_bounds = array<i64: 1, 128>}, {pipeline_mode = #tpu.pipeline_mode<synchronous>, transform_indices = @transform_5, window_bounds = array<i64: 128, 128>}, {pipeline_mode = #tpu.pipeline_mode<synchronous>, transform_indices = @transform_6, window_bounds = array<i64: 1, 128>}, {pipeline_mode = #tpu.pipeline_mode<synchronous>, transform_indices = @transform_7, window_bounds = array<i64: 128, 128>}, {pipeline_mode = #tpu.pipeline_mode<synchronous>, transform_indices = @transform_8, window_bounds = array<i64: 1, 128>}, {pipeline_mode = #tpu.pipeline_mode<synchronous>, transform_indices = @transform_9, window_bounds = array<i64: 128, 128>}, {pipeline_mode = #tpu.pipeline_mode<synchronous>, transform_indices = @transform_10, window_bounds = array<i64: 1, 128>}, {transform_indices = @transform_11, window_bounds = array<i64: 1, 2, 128>}]} {
    %c0 = arith.constant 0 : index
    %c0_0 = arith.constant 0 : index
    %0 = vector.load %arg1[%c0, %c0_0] : memref<128x128xbf16, #tpu.memory_space<vmem>>, vector<128x128xbf16>
    %c0_1 = arith.constant 0 : index
    %c0_2 = arith.constant 0 : index
    %1 = vector.load %arg4[%c0_1, %c0_2] : memref<128x128xbf16, #tpu.memory_space<vmem>>, vector<128x128xbf16>
    %cst = arith.constant dense<0.000000e+00> : vector<128x128xf32>
    %2 = tpu.matmul %0, %1, %cst {dimension_numbers = #tpu.dot_dimension_numbers<[1], [0], [0], [1], [0, 0, 1, 1], [], []>} : vector<128x128xbf16>, vector<128x128xbf16>, vector<128x128xf32> -> vector<128x128xf32>
    %c0_3 = arith.constant 0 : index
    %c0_4 = arith.constant 0 : index
    %3 = vector.load %arg5[%c0_3, %c0_4] : memref<1x128xf32, #tpu.memory_space<vmem>>, vector<1x128xf32>
    %4 = vector.broadcast %3 : vector<1x128xf32> to vector<128x128xf32>
    %5 = arith.addf %2, %4 : vector<128x128xf32>
    %cst_5 = arith.constant 0.000000e+00 : f32
    %6 = vector.broadcast %cst_5 : f32 to vector<128x128xf32>
    %7 = arith.maximumf %5, %6 : vector<128x128xf32>
    %8 = arith.truncf %7 : vector<128x128xf32> to vector<128x128xbf16>
    %c0_6 = arith.constant 0 : index
    %c0_7 = arith.constant 0 : index
    %9 = vector.load %arg6[%c0_6, %c0_7] : memref<128x128xbf16, #tpu.memory_space<vmem>>, vector<128x128xbf16>
    %cst_8 = arith.constant dense<0.000000e+00> : vector<128x128xf32>
    %10 = tpu.matmul %8, %9, %cst_8 {dimension_numbers = #tpu.dot_dimension_numbers<[1], [0], [0], [1], [0, 0, 1, 1], [], []>} : vector<128x128xbf16>, vector<128x128xbf16>, vector<128x128xf32> -> vector<128x128xf32>
    %c0_9 = arith.constant 0 : index
    %c0_10 = arith.constant 0 : index
    %11 = vector.load %arg7[%c0_9, %c0_10] : memref<1x128xf32, #tpu.memory_space<vmem>>, vector<1x128xf32>
    %12 = vector.broadcast %11 : vector<1x128xf32> to vector<128x128xf32>
    %13 = arith.addf %10, %12 : vector<128x128xf32>
    %cst_11 = arith.constant 0.000000e+00 : f32
    %14 = vector.broadcast %cst_11 : f32 to vector<128x128xf32>
    %15 = arith.maximumf %13, %14 : vector<128x128xf32>
    %c0_12 = arith.constant 0 : index
    %c0_13 = arith.constant 0 : index
    %16 = vector.load %arg2[%c0_12, %c0_13] : memref<128x128xbf16, #tpu.memory_space<vmem>>, vector<128x128xbf16>
    %c0_14 = arith.constant 0 : index
    %c0_15 = arith.constant 0 : index
    %17 = vector.load %arg8[%c0_14, %c0_15] : memref<128x128xbf16, #tpu.memory_space<vmem>>, vector<128x128xbf16>
    %cst_16 = arith.constant dense<0.000000e+00> : vector<128x128xf32>
    %18 = tpu.matmul %16, %17, %cst_16 {dimension_numbers = #tpu.dot_dimension_numbers<[1], [0], [0], [1], [0, 0, 1, 1], [], []>} : vector<128x128xbf16>, vector<128x128xbf16>, vector<128x128xf32> -> vector<128x128xf32>
    %c0_17 = arith.constant 0 : index
    %c0_18 = arith.constant 0 : index
    %19 = vector.load %arg9[%c0_17, %c0_18] : memref<1x128xf32, #tpu.memory_space<vmem>>, vector<1x128xf32>
    %20 = vector.broadcast %19 : vector<1x128xf32> to vector<128x128xf32>
    %21 = arith.addf %18, %20 : vector<128x128xf32>
    %cst_19 = arith.constant 0.000000e+00 : f32
    %22 = vector.broadcast %cst_19 : f32 to vector<128x128xf32>
    %23 = arith.maximumf %21, %22 : vector<128x128xf32>
    %24 = arith.truncf %23 : vector<128x128xf32> to vector<128x128xbf16>
    %c0_20 = arith.constant 0 : index
    %c0_21 = arith.constant 0 : index
    %25 = vector.load %arg10[%c0_20, %c0_21] : memref<128x128xbf16, #tpu.memory_space<vmem>>, vector<128x128xbf16>
    %cst_22 = arith.constant dense<0.000000e+00> : vector<128x128xf32>
    %26 = tpu.matmul %24, %25, %cst_22 {dimension_numbers = #tpu.dot_dimension_numbers<[1], [0], [0], [1], [0, 0, 1, 1], [], []>} : vector<128x128xbf16>, vector<128x128xbf16>, vector<128x128xf32> -> vector<128x128xf32>
    %c0_23 = arith.constant 0 : index
    %c0_24 = arith.constant 0 : index
    %27 = vector.load %arg11[%c0_23, %c0_24] : memref<1x128xf32, #tpu.memory_space<vmem>>, vector<1x128xf32>
    %28 = vector.broadcast %27 : vector<1x128xf32> to vector<128x128xf32>
    %29 = arith.addf %26, %28 : vector<128x128xf32>
    %cst_25 = arith.constant 0.000000e+00 : f32
    %30 = vector.broadcast %cst_25 : f32 to vector<128x128xf32>
    %31 = arith.maximumf %29, %30 : vector<128x128xf32>
    %32 = arith.mulf %15, %31 : vector<128x128xf32>
    %33 = tpu.transpose %32, [1, 0] : vector<128x128xf32> -> vector<128x128xf32>
    %cst_26 = arith.constant dense<0.000000e+00> : vector<128xf32>
    %34 = vector.multi_reduction <add>, %33, %cst_26 [0] : vector<128x128xf32> to vector<128xf32>
    %35 = vector.shape_cast %34 : vector<128xf32> to vector<1x128xf32>
    %c0_27 = arith.constant 0 : index
    %c0_28 = arith.constant 0 : index
    %c0_29 = arith.constant 0 : index
    %36 = vector.load %arg3[%c0_27, %c0_28, %c0_29] : memref<1x1x128xf32, #tpu.memory_space<vmem>>, vector<1x1x128xf32>
    %37 = vector.shape_cast %36 : vector<1x1x128xf32> to vector<1x128xf32>
    %cst_30 = arith.constant 0.000000e+00 : f32
    %38 = vector.broadcast %cst_30 : f32 to vector<1x128xf32>
    %39 = arith.maximumf %35, %38 : vector<1x128xf32>
    %40 = arith.mulf %35, %37 : vector<1x128xf32>
    %41 = arith.subf %39, %40 : vector<1x128xf32>
    %42 = math.absf %35 : vector<1x128xf32>
    %cst_31 = arith.constant 0.000000e+00 : f32
    %43 = vector.broadcast %cst_31 : f32 to vector<1x128xf32>
    %44 = arith.subf %43, %42 : vector<1x128xf32>
    %45 = math.exp %44 : vector<1x128xf32>
    %46 = math.log1p %45 : vector<1x128xf32>
    %47 = arith.addf %41, %46 : vector<1x128xf32>
    %48 = tpu.iota {dimensions = array<i32: 1>} : vector<1x128xi32>
    %c128_i32 = arith.constant 128 : i32
    %49 = arith.muli %arg0, %c128_i32 : i32
    %50 = vector.broadcast %49 : i32 to vector<1x128xi32>
    %51 = arith.addi %50, %48 : vector<1x128xi32>
    %c8_i32 = arith.constant 8 : i32
    %52 = vector.broadcast %c8_i32 : i32 to vector<1x128xi32>
    %53 = arith.cmpi slt, %51, %52 : vector<1x128xi32>
    %cst_32 = arith.constant 0.000000e+00 : f32
    %54 = vector.broadcast %cst_32 : f32 to vector<1x128xf32>
    %55 = arith.select %53, %47, %54 : vector<1x128xi1>, vector<1x128xf32>
    %56 = tpu.concatenate %35, %55 in 0 : vector<1x128xf32>, vector<1x128xf32> -> vector<2x128xf32>
    %c0_33 = arith.constant 0 : index
    %c0_34 = arith.constant 0 : index
    %c0_35 = arith.constant 0 : index
    %57 = vector.load %arg12[%c0_33, %c0_34, %c0_35] : memref<1x2x128xf32, #tpu.memory_space<vmem>>, vector<1x2x128xf32>
    %58 = vector.shape_cast %57 : vector<1x2x128xf32> to vector<2x128xf32>
    %59 = vector.shape_cast %56 : vector<2x128xf32> to vector<1x2x128xf32>
    tpu.vector_store %arg12[%c0_33, %c0_34, %c0_35], %59 {strides = array<i32>} : memref<1x2x128xf32, #tpu.memory_space<vmem>>, vector<1x2x128xf32>,
    return
  }
  func.func @transform_0(%arg0: i32) -> (i32, i32) {
    %c0_i32 = arith.constant 0 : i32
    %c0_i32_0 = arith.constant 0 : i32
    return %arg0, %c0_i32 : i32, i32
  }
  func.func @transform_1(%arg0: i32) -> (i32, i32) {
    %c0_i32 = arith.constant 0 : i32
    %c0_i32_0 = arith.constant 0 : i32
    return %arg0, %c0_i32 : i32, i32
  }
  func.func @transform_2(%arg0: i32) -> (i32, i32, i32) {
    %c0_i32 = arith.constant 0 : i32
    %c0_i32_0 = arith.constant 0 : i32
    %c0_i32_1 = arith.constant 0 : i32
    return %arg0, %c0_i32, %c0_i32_0 : i32, i32, i32
  }
  func.func @transform_3(%arg0: i32) -> (i32, i32) {
    %c0_i32 = arith.constant 0 : i32
    %c0_i32_0 = arith.constant 0 : i32
    %c0_i32_1 = arith.constant 0 : i32
    return %c0_i32, %c0_i32_0 : i32, i32
  }
  func.func @transform_4(%arg0: i32) -> (i32, i32) {
    %c0_i32 = arith.constant 0 : i32
    %c0_i32_0 = arith.constant 0 : i32
    %c0_i32_1 = arith.constant 0 : i32
    return %c0_i32, %c0_i32_0 : i32, i32
  }
  func.func @transform_5(%arg0: i32) -> (i32, i32) {
    %c0_i32 = arith.constant 0 : i32
    %c0_i32_0 = arith.constant 0 : i32
    %c0_i32_1 = arith.constant 0 : i32
    return %c0_i32, %c0_i32_0 : i32, i32
  }
  func.func @transform_6(%arg0: i32) -> (i32, i32) {
    %c0_i32 = arith.constant 0 : i32
    %c0_i32_0 = arith.constant 0 : i32
    %c0_i32_1 = arith.constant 0 : i32
    return %c0_i32, %c0_i32_0 : i32, i32
  }
  func.func @transform_7(%arg0: i32) -> (i32, i32) {
    %c0_i32 = arith.constant 0 : i32
    %c0_i32_0 = arith.constant 0 : i32
    %c0_i32_1 = arith.constant 0 : i32
    return %c0_i32, %c0_i32_0 : i32, i32
  }
  func.func @transform_8(%arg0: i32) -> (i32, i32) {
    %c0_i32 = arith.constant 0 : i32
    %c0_i32_0 = arith.constant 0 : i32
    %c0_i32_1 = arith.constant 0 : i32
    return %c0_i32, %c0_i32_0 : i32, i32
  }
  func.func @transform_9(%arg0: i32) -> (i32, i32) {
    %c0_i32 = arith.constant 0 : i32
    %c0_i32_0 = arith.constant 0 : i32
    %c0_i32_1 = arith.constant 0 : i32
    return %c0_i32, %c0_i32_0 : i32, i32
  }
  func.func @transform_10(%arg0: i32) -> (i32, i32) {
    %c0_i32 = arith.constant 0 : i32
    %c0_i32_0 = arith.constant 0 : i32
    %c0_i32_1 = arith.constant 0 : i32
    return %c0_i32, %c0_i32_0 : i32, i32
  }
  func.func @transform_11(%arg0: i32) -> (i32, i32, i32) {
    %c0_i32 = arith.constant 0 : i32
    %c0_i32_0 = arith.constant 0 : i32
    %c0_i32_1 = arith.constant 0 : i32
    return %arg0, %c0_i32, %c0_i32_0 : i32, i32, i32
  }
}

</mosaic_0001>

<bundles_post_ra>
// kernel: tpu_custom_call.1
= control target key start
LH: loop header
LB: loop body
LE: loop exit
PB: predicated region body
PF: predicated region fallthrough
CT: control target
= control target key end

     0   :  { %16 = vsyncpa [#allocation3], 0  ;;  %s1559_s0 = inlined_call_operand.hbm [shape: bf16[128,128], index: 0, kind: input, shape index: {}]   ;;  %s1560_s1 = inlined_call_operand.hbm [shape: bf16[128,128], index: 1, kind: input, shape index: {}]   ;;  %s1561_s2 = inlined_call_operand.vmem [shape: f32[1,1,128], index: 2, kind: input, shape index: {}]   ;;  %s1562_s3 = inlined_call_operand.hbm [shape: bf16[128,128], index: 3, kind: input, shape index: {}]   ;;  %s1563_s4 = inlined_call_operand.vmem [shape: f32[1,128], index: 4, kind: input, shape index: {}]   ;;  %s1564_s5 = inlined_call_operand.hbm [shape: bf16[128,128], index: 5, kind: input, shape index: {}]   ;;  %s1565_s6 = inlined_call_operand.vmem [shape: f32[1,128], index: 6, kind: input, shape index: {}]   ;;  %s1566_s7 = inlined_call_operand.hbm [shape: bf16[128,128], index: 7, kind: input, shape index: {}]   ;;  %s1567_s8 = inlined_call_operand.vmem [shape: f32[1,128], index: 8, kind: input, shape index: {}]   ;;  %s1568_s9 = inlined_call_operand.hbm [shape: bf16[128,128], index: 9, kind: input, shape index: {}]   ;;  %s1569_s10 = inlined_call_operand.vmem [shape: f32[1,128], index: 10, kind: input, shape index: {}]   ;;  %s1570_s11 = inlined_call_operand.hbm [shape: f32[1,2,128], index: 11, kind: output, shape index: {}]  }
   0x1   :  { %17 = vsyncpa [#allocation6], 0 }
   0x2   :  { %18 = vsyncpa [#allocation9], 0 }
   0x3   :  { %19 = vsyncpa [#allocation12], 0 }
   0x4   :  { %20 = vsyncpa [#allocation4], 0  ;;  %s38_s19 = sshll.u32 %s1560_s1, 4  ;;  %s1364_s20 = smov [#allocation5]   ;;  %s39_s19 = int_to_ptr.hbm [resolvable:$true] %s38_s19 }
   0x5   :  { %s40_s21 = sshll.u32 %s1364_s20, 4  ;;  %s68_s24 = sshll.u32 %s1564_s5, 4  ;;  %s41_s21 = int_to_ptr.vmem [resolvable:$true] %s40_s21  ;;  %s69_s24 = int_to_ptr.hbm [resolvable:$true] %s68_s24 }
   0x6   :  { %s1365_s25 = smov 64   ;;  %s1366_s26 = smov 4  }
   0x7   :  { %46 = dma.hbm_to_vmem [thread:$0]  %s39_s19, 1024, %s41_s21, [#allocation6], %s1365_s25, %s1365_s25, %s1366_s26  }
   0x8   :  { %s1367_s27 = smov [#allocation8]   ;;  %s25_s1 = sshll.u32 %s1559_s0, 4  ;;  %s26_s1 = int_to_ptr.hbm [resolvable:$true] %s25_s1 }
   0x9   :  { %s70_s28 = sshll.u32 %s1367_s27, 4  ;;  %s53_s13 = sshll.u32 %s1562_s3, 4  ;;  %s71_s28 = int_to_ptr.vmem [resolvable:$true] %s70_s28  ;;  %s54_s13 = int_to_ptr.hbm [resolvable:$true] %s53_s13 }
   0xa   :  { %76 = dma.hbm_to_vmem [thread:$0]  %s69_s24, 1024, %s71_s28, [#allocation9], %s1365_s25, %s1365_s25, %s1366_s26  }
   0xb   :  { %s1368_s14 = smov [#allocation2]   ;;  %s1369_s16 = smov [#allocation7]  }
   0xc   :  { %s27_s15 = sshll.u32 %s1368_s14, 4  ;;  %s55_s0 = sshll.u32 %s1369_s16, 4  ;;  %s28_s15 = int_to_ptr.vmem [resolvable:$true] %s27_s15  ;;  %s56_s0 = int_to_ptr.vmem [resolvable:$true] %s55_s0 }
   0xd   :  { %33 = dma.hbm_to_vmem [thread:$0]  %s26_s1, 1024, %s28_s15, [#allocation3], %s1365_s25, %s1365_s25, %s1366_s26  }
   0xe   :  { %s83_s19 = sshll.u32 %s1566_s7, 4  ;;  %s98_s21 = sshll.u32 %s1568_s9, 4  ;;  %s84_s19 = int_to_ptr.hbm [resolvable:$true] %s83_s19  ;;  %s99_s21 = int_to_ptr.hbm [resolvable:$true] %s98_s21 }
   0xf   :  { %61 = dma.hbm_to_vmem [thread:$0]  %s54_s13, 1024, %s56_s0, [#allocation6], %s1365_s25, %s1365_s25, %s1366_s26  }
  0x10   :  { %s1370_s22 = smov [#allocation10]   ;;  %s1371_s24 = smov [#allocation11]  }
  0x11   :  { %s85_s23 = sshll.u32 %s1370_s22, 4  ;;  %s100_s7 = sshll.u32 %s1371_s24, 4  ;;  %s86_s23 = int_to_ptr.vmem [resolvable:$true] %s85_s23  ;;  %s101_s7 = int_to_ptr.vmem [resolvable:$true] %s100_s7 }
  0x12   :  { %91 = dma.hbm_to_vmem [thread:$0]  %s84_s19, 1024, %s86_s23, [#allocation9], %s1365_s25, %s1365_s25, %s1366_s26  }
  0x13   :  { %106 = dma.hbm_to_vmem [thread:$0]  %s99_s21, 1024, %s101_s7, [#allocation12], %s1365_s25, %s1365_s25, %s1366_s26  }
  0x14   :  { %1354 = dma.done.wait [#allocation3], 1024  }
  0x15   :  { %1355 = vsyncadd [#allocation3], 4294966272 }
  0x16   :  { %1356 = dma.done.wait [#allocation6], 2048  }
  0x17   :  { %1357 = vsyncadd [#allocation6], 4294965248 }
  0x18   :  { %1358 = dma.done.wait [#allocation9], 2048  }
  0x19   :  { %1359 = vsyncadd [#allocation9], 4294965248 }
  0x1a   :  { %1360 = dma.done.wait [#allocation12], 1024  }
  0x1b   :  { %1361 = vsyncadd [#allocation12], 4294966272  ;;  %v1136_v0 = vld [vmem:[#allocation7 + $0x38] sm:$0xff]  ;;  %v1135_v2 = vld [vmem:[#allocation7 + $0x30] sm:$0xff]  ;;  %s1372_s30 = smov [#allocation13]   ;;  %vm906_vm2 = vcmask 1040384  }
  0x1c   :  { %v1160_v1 = vld [vmem:[#allocation10 + $0x38] sm:$0xff]  ;;  %265 = vmatpush.bf16.msra.mxu0 %v1136_v0  ;;  %v1159_v3 = vld [vmem:[#allocation10 + $0x30] sm:$0xff]  ;;  %v1134_v4 = vld [vmem:[#allocation7 + $0x28] sm:$0xff]  ;;  %s914_s1 = sshll.u32 %s1372_s30, 4  ;;  %s915_s1 = int_to_ptr.vmem [resolvable:$true] %s914_s1 }
  0x1d   :  { %603 = vmatpush.bf16.msra.mxu2 %v1160_v1  ;;  %v1158_v5 = vld [vmem:[#allocation10 + $0x28] sm:$0xff]  ;;  %v1133_v6 = vld [vmem:[#allocation7 + $0x20] sm:$0xff]  ;;  %v1132_v8 = vld [vmem:[#allocation7 + $0x18] sm:$0xff] }
  0x1e   :  { %v1157_v7 = vld [vmem:[#allocation10 + $0x20] sm:$0xff]  ;;  %v1156_v9 = vld [vmem:[#allocation10 + $0x18] sm:$0xff]  ;;  %v1131_v10 = vld [vmem:[#allocation7 + $0x10] sm:$0xff] }
  0x1f   :  { %v1155_v11 = vld [vmem:[#allocation10 + $0x10] sm:$0xff]  ;;  %v1130_v12 = vld [vmem:[#allocation7 + $0x8] sm:$0xff]  ;;  %v1129_v14 = vld [vmem:[#allocation7] sm:$0xff] }
  0x20   :  { %266 = vmatpush.bf16.msra.mxu0 %v1135_v2  ;;  %v1154_v13 = vld [vmem:[#allocation10 + $0x8] sm:$0xff]  ;;  %v1153_v15 = vld [vmem:[#allocation10] sm:$0xff]  ;;  %v1123_v20 = vld [vmem:[#allocation2 + $0x10] sm:$0xff] }
  0x21   :  { %604 = vmatpush.bf16.msra.mxu2 %v1159_v3  ;;  %v1121_v16 = vld [vmem:[#allocation2] sm:$0xff]  ;;  %v1122_v18 = vld [vmem:[#allocation2 + $0x8] sm:$0xff]  ;;  %v1147_v21 = vld [vmem:[#allocation5 + $0x10] sm:$0xff] }
  0x22   :  { %v1145_v17 = vld [vmem:[#allocation5] sm:$0xff]  ;;  %v1146_v19 = vld [vmem:[#allocation5 + $0x8] sm:$0xff]  ;;  %v1124_v22 = vld [vmem:[#allocation2 + $0x18] sm:$0xff] }
  0x23   :  { %v1148_v23 = vld [vmem:[#allocation5 + $0x18] sm:$0xff]  ;;  %v1125_v24 = vld [vmem:[#allocation2 + $0x20] sm:$0xff]  ;;  %v1126_v27 = vld [vmem:[#allocation2 + $0x28] sm:$0xff] }
  0x24   :  { %267 = vmatpush.bf16.msra.mxu0 %v1134_v4  ;;  %v1149_v25 = vld [vmem:[#allocation5 + $0x20] sm:$0xff]  ;;  %v1144_v26 = vld [vmem:[#allocation8 + $0x38] sm:$0xff]  ;;  %v1150_v28 = vld [vmem:[#allocation5 + $0x28] sm:$0xff] }
  0x25   :  { %605 = vmatpush.bf16.msra.mxu2 %v1158_v5  ;;  %406 = vmatpush.bf16.msra.mxu1 %v1144_v26  ;;  %v1143_v29 = vld [vmem:[#allocation8 + $0x30] sm:$0xff]  ;;  %v1168_v30 = vld [vmem:[#allocation11 + $0x38] sm:$0xff]  ;;  %v1142_v31 = vld [vmem:[#allocation8 + $0x28] sm:$0xff] }
  0x26   :  { %744 = vmatpush.bf16.msra.mxu3 %v1168_v30  ;;  %v1167_v32 = vld [vmem:[#allocation11 + $0x30] sm:$0xff]  ;;  %v1141_v33 = vld [vmem:[#allocation8 + $0x20] sm:$0xff]  ;;  %v1166_v34 = vld [vmem:[#allocation11 + $0x28] sm:$0xff] }
  0x27   :  { %v1140_v35 = vld [vmem:[#allocation8 + $0x18] sm:$0xff]  ;;  %v1127_v36 = vld [vmem:[#allocation2 + $0x30] sm:$0xff]  ;;  %v1165_v38 = vld [vmem:[#allocation11 + $0x20] sm:$0xff] }
  0x28   :  { %268 = vmatpush.bf16.msra.mxu0 %v1133_v6  ;;  %v1151_v37 = vld [vmem:[#allocation5 + $0x30] sm:$0xff]  ;;  %v1164_v40 = vld [vmem:[#allocation11 + $0x18] sm:$0xff]  ;;  %v1138_v41 = vld [vmem:[#allocation8 + $0x8] sm:$0xff] }
  0x29   :  { %606 = vmatpush.bf16.msra.mxu2 %v1157_v7  ;;  %407 = vmatpush.bf16.msra.mxu1 %v1143_v29  ;;  %v1139_v39 = vld [vmem:[#allocation8 + $0x10] sm:$0xff]  ;;  %v1137_v43 = vld [vmem:[#allocation8] sm:$0xff]  ;;  %v1162_v44 = vld [vmem:[#allocation11 + $0x8] sm:$0xff] }
  0x2a   :  { %745 = vmatpush.bf16.msra.mxu3 %v1167_v32  ;;  %v1163_v42 = vld [vmem:[#allocation11 + $0x10] sm:$0xff]  ;;  %v1128_v45 = vld [vmem:[#allocation2 + $0x38] sm:$0xff]  ;;  %v1161_v47 = vld [vmem:[#allocation11] sm:$0xff] }
  0x2b   :  { %v1152_v46 = vld [vmem:[#allocation5 + $0x38] sm:$0xff]  ;;  %v1472_v49 = vld [vmem:[%s1563_s4] ss:$0 sm:$0xff] }
  0x2c   :  { %269 = vmatpush.bf16.msra.mxu0 %v1132_v8  ;;  %v1478_v54 = vld [vmem:[%s1567_s8] ss:$0 sm:$0xff] }
  0x2d   :  { %607 = vmatpush.bf16.msra.mxu2 %v1156_v9  ;;  %408 = vmatpush.bf16.msra.mxu1 %v1142_v31 }
  0x2e   :  { %746 = vmatpush.bf16.msra.mxu3 %v1166_v34 }
  0x30   :  { %270 = vmatpush.bf16.msra.mxu0 %v1131_v10 }
  0x31   :  { %608 = vmatpush.bf16.msra.mxu2 %v1155_v11  ;;  %409 = vmatpush.bf16.msra.mxu1 %v1141_v33 }
  0x32   :  { %747 = vmatpush.bf16.msra.mxu3 %v1165_v38 }
  0x34   :  { %271 = vmatpush.bf16.msra.mxu0 %v1130_v12 }
  0x35   :  { %609 = vmatpush.bf16.msra.mxu2 %v1154_v13  ;;  %410 = vmatpush.bf16.msra.mxu1 %v1140_v35 }
  0x36   :  { %748 = vmatpush.bf16.msra.mxu3 %v1164_v40 }
  0x38   :  { %272 = vmatpush.bf16.msra.mxu0 %v1129_v14 }
  0x39   :  { %610 = vmatpush.bf16.msra.mxu2 %v1153_v15  ;;  %411 = vmatpush.bf16.msra.mxu1 %v1139_v39 }
  0x3a   :  { %749 = vmatpush.bf16.msra.mxu3 %v1163_v42 }
  0x3b   :  { %273 = vmatmul.bf16.vlgmr.msra.gmra.mxu0 %v1121_v16 }
  0x3c   :  { %611 = vmatmul.bf16.vlgmr.msra.gmra.mxu2 %v1145_v17 }
  0x3d   :  { %412 = vmatpush.bf16.msra.mxu1 %v1138_v41 }
  0x3e   :  { %750 = vmatpush.bf16.msra.mxu3 %v1162_v44 }
  0x41   :  { %413 = vmatpush.bf16.msra.mxu1 %v1137_v43 }
  0x42   :  { %751 = vmatpush.bf16.msra.mxu3 %v1161_v47 }
  0x4b   :  { %278 = vmatmul.bf16.gmra.mxu0 %v1122_v18 }
  0x4c   :  { %616 = vmatmul.bf16.gmra.mxu2 %v1146_v19 }
  0x5b   :  { %283 = vmatmul.bf16.gmra.mxu0 %v1123_v20 }
  0x5c   :  { %621 = vmatmul.bf16.gmra.mxu2 %v1147_v21 }
  0x6b   :  { %288 = vmatmul.bf16.gmra.mxu0 %v1124_v22 }
  0x6c   :  { %626 = vmatmul.bf16.gmra.mxu2 %v1148_v23 }
  0x7b   :  { %293 = vmatmul.bf16.gmra.mxu0 %v1125_v24 }
  0x7c   :  { %631 = vmatmul.bf16.gmra.mxu2 %v1149_v25 }
  0x8b   :  { %298 = vmatmul.bf16.gmra.mxu0 %v1126_v27 }
  0x8c   :  { %636 = vmatmul.bf16.gmra.mxu2 %v1150_v28 }
  0x9b   :  { %303 = vmatmul.bf16.gmra.mxu0 %v1127_v36 }
  0x9c   :  { %641 = vmatmul.bf16.gmra.mxu2 %v1151_v37 }
  0xab   :  { %308 = vmatmul.bf16.gmra.mxu0 %v1128_v45 }
  0xac   :  { %646 = vmatmul.bf16.gmra.mxu2 %v1152_v46 }
  0xb8   :  { %v274_v48 = vpop.f32.mrf.mxu0 }
  0xb9   :  { %v275_v50 = vadd.f32 %v1472_v49, %v274_v48 }
  0xbb   :  { %v314_v53 = vmax.f32 %v275_v50, 0.0 }
  0xbf   :  { %v612_v51 = vpop.f32.mrf.mxu2 }
  0xc0   :  { %v276_v52 = vpop.f32.mrf.mxu0  ;;  %v613_v57 = vadd.f32 %v1478_v54, %v612_v51 }
  0xc1   :  { %v277_v55 = vadd.f32 %v1472_v49, %v276_v52 }
  0xc2   :  { %v652_v62 = vmax.f32 %v613_v57, 0.0 }
  0xc3   :  { %v315_v56 = vmax.f32 %v277_v55, 0.0 }
  0xc5   :  { %v330_v58 = vpack.c.bf16 %v315_v56, %v314_v53 }
  0xc7   :  { %v614_v59 = vpop.f32.mrf.mxu2  ;;  %414 = vmatmul.bf16.vlgmr.msra.gmra.mxu1 %v330_v58 }
  0xc8   :  { %v615_v60 = vadd.f32 %v1478_v54, %v614_v59  ;;  %v279_v61 = vpop.f32.mrf.mxu0 }
  0xc9   :  { %v280_v1 = vadd.f32 %v1472_v49, %v279_v61 }
  0xca   :  { %v653_v63 = vmax.f32 %v615_v60, 0.0 }
  0xcb   :  { %v316_v4 = vmax.f32 %v280_v1, 0.0 }
  0xcc   :  { %v668_v0 = vpack.c.bf16 %v653_v63, %v652_v62 }
  0xce   :  { %752 = vmatmul.bf16.vlgmr.msra.gmra.mxu3 %v668_v0 }
  0xcf   :  { %v617_v2 = vpop.f32.mrf.mxu2 }
  0xd0   :  { %v281_v3 = vpop.f32.mrf.mxu0  ;;  %v618_v7 = vadd.f32 %v1478_v54, %v617_v2 }
  0xd1   :  { %v282_v5 = vadd.f32 %v1472_v49, %v281_v3 }
  0xd2   :  { %v654_v12 = vmax.f32 %v618_v7, 0.0 }
  0xd3   :  { %v317_v6 = vmax.f32 %v282_v5, 0.0 }
  0xd5   :  { %v331_v8 = vpack.c.bf16 %v317_v6, %v316_v4 }
  0xd7   :  { %v619_v9 = vpop.f32.mrf.mxu2  ;;  %419 = vmatmul.bf16.gmra.mxu1 %v331_v8 }
  0xd8   :  { %v620_v10 = vadd.f32 %v1478_v54, %v619_v9  ;;  %v284_v11 = vpop.f32.mrf.mxu0 }
  0xd9   :  { %v285_v15 = vadd.f32 %v1472_v49, %v284_v11 }
  0xda   :  { %v655_v13 = vmax.f32 %v620_v10, 0.0 }
  0xdb   :  { %v318_v18 = vmax.f32 %v285_v15, 0.0 }
  0xdc   :  { %v669_v14 = vpack.c.bf16 %v655_v13, %v654_v12 }
  0xde   :  { %757 = vmatmul.bf16.gmra.mxu3 %v669_v14 }
  0xdf   :  { %v622_v16 = vpop.f32.mrf.mxu2 }
  0xe0   :  { %v286_v17 = vpop.f32.mrf.mxu0  ;;  %v623_v21 = vadd.f32 %v1478_v54, %v622_v16 }
  0xe1   :  { %v287_v19 = vadd.f32 %v1472_v49, %v286_v17 }
  0xe2   :  { %v656_v26 = vmax.f32 %v623_v21, 0.0 }
  0xe3   :  { %v319_v20 = vmax.f32 %v287_v19, 0.0 }
  0xe5   :  { %v332_v22 = vpack.c.bf16 %v319_v20, %v318_v18 }
  0xe7   :  { %v624_v23 = vpop.f32.mrf.mxu2  ;;  %424 = vmatmul.bf16.gmra.mxu1 %v332_v22 }
  0xe8   :  { %v625_v24 = vadd.f32 %v1478_v54, %v624_v23  ;;  %v289_v25 = vpop.f32.mrf.mxu0 }
  0xe9   :  { %v290_v29 = vadd.f32 %v1472_v49, %v289_v25 }
  0xea   :  { %v657_v27 = vmax.f32 %v625_v24, 0.0 }
  0xeb   :  { %v320_v32 = vmax.f32 %v290_v29, 0.0 }
  0xec   :  { %v670_v28 = vpack.c.bf16 %v657_v27, %v656_v26 }
  0xee   :  { %762 = vmatmul.bf16.gmra.mxu3 %v670_v28 }
  0xef   :  { %v627_v30 = vpop.f32.mrf.mxu2 }
  0xf0   :  { %v291_v31 = vpop.f32.mrf.mxu0  ;;  %v628_v35 = vadd.f32 %v1478_v54, %v627_v30 }
  0xf1   :  { %v292_v33 = vadd.f32 %v1472_v49, %v291_v31 }
  0xf2   :  { %v658_v40 = vmax.f32 %v628_v35, 0.0 }
  0xf3   :  { %v321_v34 = vmax.f32 %v292_v33, 0.0 }
  0xf5   :  { %v333_v36 = vpack.c.bf16 %v321_v34, %v320_v32 }
  0xf7   :  { %v629_v37 = vpop.f32.mrf.mxu2  ;;  %429 = vmatmul.bf16.gmra.mxu1 %v333_v36 }
  0xf8   :  { %v630_v38 = vadd.f32 %v1478_v54, %v629_v37  ;;  %v294_v39 = vpop.f32.mrf.mxu0  ;;  %v1514_v37 = vld [vmem:[%s1565_s6] ss:$0 sm:$0xff] }
  0xf9   :  { %v295_v43 = vadd.f32 %v1472_v49, %v294_v39 }
  0xfa   :  { %v659_v41 = vmax.f32 %v630_v38, 0.0 }
  0xfb   :  { %v322_v46 = vmax.f32 %v295_v43, 0.0 }
  0xfc   :  { %v671_v42 = vpack.c.bf16 %v659_v41, %v658_v40 }
  0xfe   :  { %767 = vmatmul.bf16.gmra.mxu3 %v671_v42 }
  0xff   :  { %v632_v44 = vpop.f32.mrf.mxu2 }
 0x100   :  { %v296_v45 = vpop.f32.mrf.mxu0  ;;  %v633_v50 = vadd.f32 %v1478_v54, %v632_v44 }
 0x101   :  { %v297_v47 = vadd.f32 %v1472_v49, %v296_v45 }
 0x102   :  { %v660_v56 = vmax.f32 %v633_v50, 0.0 }
 0x103   :  { %v323_v48 = vmax.f32 %v297_v47, 0.0 }
 0x105   :  { %v334_v51 = vpack.c.bf16 %v323_v48, %v322_v46 }
 0x107   :  { %v634_v52 = vpop.f32.mrf.mxu2  ;;  %434 = vmatmul.bf16.gmra.mxu1 %v334_v51 }
 0x108   :  { %v635_v53 = vadd.f32 %v1478_v54, %v634_v52  ;;  %v299_v55 = vpop.f32.mrf.mxu0 }
 0x109   :  { %v300_v59 = vadd.f32 %v1472_v49, %v299_v55 }
 0x10a   :  { %v661_v57 = vmax.f32 %v635_v53, 0.0 }
 0x10b   :  { %v324_v62 = vmax.f32 %v300_v59, 0.0 }
 0x10c   :  { %v672_v58 = vpack.c.bf16 %v661_v57, %v660_v56 }
 0x10e   :  { %772 = vmatmul.bf16.gmra.mxu3 %v672_v58 }
 0x10f   :  { %v637_v60 = vpop.f32.mrf.mxu2 }
 0x110   :  { %v301_v61 = vpop.f32.mrf.mxu0  ;;  %v638_v1 = vadd.f32 %v1478_v54, %v637_v60 }
 0x111   :  { %v302_v63 = vadd.f32 %v1472_v49, %v301_v61 }
 0x112   :  { %v662_v6 = vmax.f32 %v638_v1, 0.0 }
 0x113   :  { %v325_v0 = vmax.f32 %v302_v63, 0.0 }
 0x115   :  { %v335_v2 = vpack.c.bf16 %v325_v0, %v324_v62 }
 0x117   :  { %v639_v3 = vpop.f32.mrf.mxu2  ;;  %439 = vmatmul.bf16.gmra.mxu1 %v335_v2 }
 0x118   :  { %v640_v4 = vadd.f32 %v1478_v54, %v639_v3  ;;  %v304_v5 = vpop.f32.mrf.mxu0 }
 0x119   :  { %v305_v9 = vadd.f32 %v1472_v49, %v304_v5 }
 0x11a   :  { %v663_v7 = vmax.f32 %v640_v4, 0.0 }
 0x11b   :  { %v326_v12 = vmax.f32 %v305_v9, 0.0 }
 0x11c   :  { %v673_v8 = vpack.c.bf16 %v663_v7, %v662_v6 }
 0x11e   :  { %777 = vmatmul.bf16.gmra.mxu3 %v673_v8 }
 0x11f   :  { %v642_v10 = vpop.f32.mrf.mxu2 }
 0x120   :  { %v306_v11 = vpop.f32.mrf.mxu0  ;;  %v643_v15 = vadd.f32 %v1478_v54, %v642_v10 }
 0x121   :  { %v307_v13 = vadd.f32 %v1472_v49, %v306_v11 }
 0x122   :  { %v664_v20 = vmax.f32 %v643_v15, 0.0 }
 0x123   :  { %v327_v14 = vmax.f32 %v307_v13, 0.0 }
 0x125   :  { %v336_v16 = vpack.c.bf16 %v327_v14, %v326_v12 }
 0x127   :  { %v644_v17 = vpop.f32.mrf.mxu2  ;;  %444 = vmatmul.bf16.gmra.mxu1 %v336_v16 }
 0x128   :  { %v645_v18 = vadd.f32 %v1478_v54, %v644_v17  ;;  %v309_v19 = vpop.f32.mrf.mxu0 }
 0x129   :  { %v310_v23 = vadd.f32 %v1472_v49, %v309_v19 }
 0x12a   :  { %v665_v21 = vmax.f32 %v645_v18, 0.0 }
 0x12b   :  { %v328_v26 = vmax.f32 %v310_v23, 0.0 }
 0x12c   :  { %v674_v22 = vpack.c.bf16 %v665_v21, %v664_v20 }
 0x12e   :  { %782 = vmatmul.bf16.gmra.mxu3 %v674_v22 }
 0x12f   :  { %v647_v24 = vpop.f32.mrf.mxu2 }
 0x130   :  { %v311_v25 = vpop.f32.mrf.mxu0  ;;  %v648_v29 = vadd.f32 %v1478_v54, %v647_v24 }
 0x131   :  { %v312_v27 = vadd.f32 %v1472_v49, %v311_v25  ;;  %v1519_v49 = vld [vmem:[%s1569_s10] ss:$0 sm:$0xff] }
 0x132   :  { %v666_v33 = vmax.f32 %v648_v29, 0.0 }
 0x133   :  { %v329_v28 = vmax.f32 %v312_v27, 0.0 }
 0x135   :  { %v337_v30 = vpack.c.bf16 %v329_v28, %v328_v26 }
 0x137   :  { %v649_v31 = vpop.f32.mrf.mxu2  ;;  %449 = vmatmul.bf16.gmra.mxu1 %v337_v30 }
 0x138   :  { %v650_v32 = vadd.f32 %v1478_v54, %v649_v31 }
 0x13a   :  { %v667_v34 = vmax.f32 %v650_v32, 0.0 }
 0x13c   :  { %v675_v35 = vpack.c.bf16 %v667_v34, %v666_v33 }
 0x13e   :  { %787 = vmatmul.bf16.gmra.mxu3 %v675_v35 }
 0x144   :  { %v415_v36 = vpop.f32.mrf.mxu1 }
 0x145   :  { %v416_v39 = vadd.f32 %v1514_v37, %v415_v36 }
 0x147   :  { %v455_v41 = vmax.f32 %v416_v39, 0.0 }
 0x14c   :  { %v417_v38 = vpop.f32.mrf.mxu1 }
 0x14d   :  { %v418_v45 = vadd.f32 %v1514_v37, %v417_v38 }
 0x14f   :  { %v456_v48 = vmax.f32 %v418_v45, 0.0 }
 0x151   :  { %v753_v54 = vpop.f32.mrf.mxu3 }
 0x152   :  { %v754_v40 = vadd.f32 %v1519_v49, %v753_v54 }
 0x154   :  { %v793_v42 = vmax.f32 %v754_v40, 0.0  ;;  %v420_v43 = vpop.f32.mrf.mxu1 }
 0x155   :  { %v421_v53 = vadd.f32 %v1514_v37, %v420_v43 }
 0x156   :  { %v809_v44 = vmul.f32 %v793_v42, %v455_v41 }
 0x157   :  { %v457_v57 = vmax.f32 %v421_v53, 0.0 }
 0x158   :  { %825 = vxpose.xlu0.b32.start [1/16] %v809_v44, 128 }
 0x159   :  { %v755_v46 = vpop.f32.mrf.mxu3 }
 0x15a   :  { %v756_v47 = vadd.f32 %v1519_v49, %v755_v46 }
 0x15c   :  { %v794_v50 = vmax.f32 %v756_v47, 0.0  ;;  %v422_v51 = vpop.f32.mrf.mxu1 }
 0x15d   :  { %v423_v61 = vadd.f32 %v1514_v37, %v422_v51 }
 0x15e   :  { %v810_v52 = vmul.f32 %v794_v50, %v456_v48 }
 0x15f   :  { %v458_v0 = vmax.f32 %v423_v61, 0.0 }
 0x160   :  { %826 = vxpose.xlu0.b32.cont [2/16] %v810_v52, 128 }
 0x161   :  { %v758_v55 = vpop.f32.mrf.mxu3 }
 0x162   :  { %v759_v56 = vadd.f32 %v1519_v49, %v758_v55 }
 0x164   :  { %v795_v58 = vmax.f32 %v759_v56, 0.0  ;;  %v425_v59 = vpop.f32.mrf.mxu1 }
 0x165   :  { %v426_v4 = vadd.f32 %v1514_v37, %v425_v59 }
 0x166   :  { %v811_v60 = vmul.f32 %v795_v58, %v457_v57 }
 0x167   :  { %v459_v7 = vmax.f32 %v426_v4, 0.0 }
 0x168   :  { %827 = vxpose.xlu0.b32.cont [3/16] %v811_v60, 128 }
 0x169   :  { %v760_v62 = vpop.f32.mrf.mxu3 }
 0x16a   :  { %v761_v63 = vadd.f32 %v1519_v49, %v760_v62 }
 0x16c   :  { %v796_v1 = vmax.f32 %v761_v63, 0.0  ;;  %v427_v2 = vpop.f32.mrf.mxu1 }
 0x16d   :  { %v428_v11 = vadd.f32 %v1514_v37, %v427_v2 }
 0x16e   :  { %v812_v3 = vmul.f32 %v796_v1, %v458_v0 }
 0x16f   :  { %v460_v14 = vmax.f32 %v428_v11, 0.0 }
 0x170   :  { %828 = vxpose.xlu0.b32.cont [4/16] %v812_v3, 128 }
 0x171   :  { %v763_v5 = vpop.f32.mrf.mxu3 }
 0x172   :  { %v764_v6 = vadd.f32 %v1519_v49, %v763_v5 }
 0x174   :  { %v797_v8 = vmax.f32 %v764_v6, 0.0  ;;  %v430_v9 = vpop.f32.mrf.mxu1 }
 0x175   :  { %v431_v18 = vadd.f32 %v1514_v37, %v430_v9 }
 0x176   :  { %v813_v10 = vmul.f32 %v797_v8, %v459_v7 }
 0x177   :  { %v461_v21 = vmax.f32 %v431_v18, 0.0 }
 0x178   :  { %829 = vxpose.xlu0.b32.cont [5/16] %v813_v10, 128 }
 0x179   :  { %v765_v12 = vpop.f32.mrf.mxu3 }
 0x17a   :  { %v766_v13 = vadd.f32 %v1519_v49, %v765_v12 }
 0x17c   :  { %v798_v15 = vmax.f32 %v766_v13, 0.0  ;;  %v432_v16 = vpop.f32.mrf.mxu1 }
 0x17d   :  { %v433_v25 = vadd.f32 %v1514_v37, %v432_v16 }
 0x17e   :  { %v814_v17 = vmul.f32 %v798_v15, %v460_v14 }
 0x17f   :  { %v462_v28 = vmax.f32 %v433_v25, 0.0 }
 0x180   :  { %830 = vxpose.xlu0.b32.cont [6/16] %v814_v17, 128 }
 0x181   :  { %v768_v19 = vpop.f32.mrf.mxu3 }
 0x182   :  { %v769_v20 = vadd.f32 %v1519_v49, %v768_v19 }
 0x184   :  { %v799_v22 = vmax.f32 %v769_v20, 0.0  ;;  %v435_v23 = vpop.f32.mrf.mxu1 }
 0x185   :  { %v436_v32 = vadd.f32 %v1514_v37, %v435_v23 }
 0x186   :  { %v815_v24 = vmul.f32 %v799_v22, %v461_v21 }
 0x187   :  { %v463_v35 = vmax.f32 %v436_v32, 0.0 }
 0x188   :  { %831 = vxpose.xlu0.b32.cont [7/16] %v815_v24, 128 }
 0x189   :  { %v770_v26 = vpop.f32.mrf.mxu3 }
 0x18a   :  { %v771_v27 = vadd.f32 %v1519_v49, %v770_v26 }
 0x18c   :  { %v800_v29 = vmax.f32 %v771_v27, 0.0  ;;  %v437_v30 = vpop.f32.mrf.mxu1 }
 0x18d   :  { %v438_v54 = vadd.f32 %v1514_v37, %v437_v30 }
 0x18e   :  { %v816_v31 = vmul.f32 %v800_v29, %v462_v28 }
 0x18f   :  { %v464_v42 = vmax.f32 %v438_v54, 0.0 }
 0x190   :  { %832 = vxpose.xlu0.b32.cont [8/16] %v816_v31, 128 }
 0x191   :  { %v773_v33 = vpop.f32.mrf.mxu3 }
 0x192   :  { %v774_v34 = vadd.f32 %v1519_v49, %v773_v33 }
 0x194   :  { %v801_v36 = vmax.f32 %v774_v34, 0.0  ;;  %v440_v38 = vpop.f32.mrf.mxu1 }
 0x195   :  { %v441_v46 = vadd.f32 %v1514_v37, %v440_v38 }
 0x196   :  { %v817_v39 = vmul.f32 %v801_v36, %v463_v35 }
 0x197   :  { %v465_v50 = vmax.f32 %v441_v46, 0.0 }
 0x198   :  { %833 = vxpose.xlu0.b32.cont [9/16] %v817_v39, 128 }
 0x199   :  { %v775_v40 = vpop.f32.mrf.mxu3 }
 0x19a   :  { %v776_v41 = vadd.f32 %v1519_v49, %v775_v40 }
 0x19c   :  { %v802_v43 = vmax.f32 %v776_v41, 0.0  ;;  %v442_v44 = vpop.f32.mrf.mxu1 }
 0x19d   :  { %v443_v55 = vadd.f32 %v1514_v37, %v442_v44 }
 0x19e   :  { %v818_v45 = vmul.f32 %v802_v43, %v464_v42 }
 0x19f   :  { %v466_v58 = vmax.f32 %v443_v55, 0.0 }
 0x1a0   :  { %834 = vxpose.xlu0.b32.cont [10/16] %v818_v45, 128 }
 0x1a1   :  { %v778_v47 = vpop.f32.mrf.mxu3 }
 0x1a2   :  { %v779_v48 = vadd.f32 %v1519_v49, %v778_v47 }
 0x1a4   :  { %v803_v51 = vmax.f32 %v779_v48, 0.0  ;;  %v445_v53 = vpop.f32.mrf.mxu1 }
 0x1a5   :  { %v446_v61 = vadd.f32 %v1514_v37, %v445_v53 }
 0x1a6   :  { %v819_v52 = vmul.f32 %v803_v51, %v465_v50 }
 0x1a7   :  { %v467_v1 = vmax.f32 %v446_v61, 0.0 }
 0x1a8   :  { %835 = vxpose.xlu0.b32.cont [11/16] %v819_v52, 128 }
 0x1a9   :  { %v780_v56 = vpop.f32.mrf.mxu3 }
 0x1aa   :  { %v781_v57 = vadd.f32 %v1519_v49, %v780_v56 }
 0x1ac   :  { %v804_v59 = vmax.f32 %v781_v57, 0.0  ;;  %v447_v62 = vpop.f32.mrf.mxu1 }
 0x1ad   :  { %v448_v4 = vadd.f32 %v1514_v37, %v447_v62 }
 0x1ae   :  { %v820_v60 = vmul.f32 %v804_v59, %v466_v58 }
 0x1af   :  { %v468_v8 = vmax.f32 %v448_v4, 0.0  ;;  %v896_v4 = vlaneseq }
 0x1b0   :  { %836 = vxpose.xlu0.b32.cont [12/16] %v820_v60, 128 }
 0x1b1   :  { %v783_v63 = vpop.f32.mrf.mxu3 }
 0x1b2   :  { %v784_v0 = vadd.f32 %v1519_v49, %v783_v63 }
 0x1b4   :  { %v805_v2 = vmax.f32 %v784_v0, 0.0  ;;  %v450_v7 = vpop.f32.mrf.mxu1 }
 0x1b5   :  { %v451_v11 = vadd.f32 %v1514_v37, %v450_v7 }
 0x1b6   :  { %v821_v3 = vmul.f32 %v805_v2, %v467_v1 }
 0x1b7   :  { %v469_v14 = vmax.f32 %v451_v11, 0.0 }
 0x1b8   :  { %837 = vxpose.xlu0.b32.cont [13/16] %v821_v3, 128  ;;  %v878_v3 = vld [vmem:[%s1561_s2] sm:$0x1]  ;;  %s916_s2 = sshll.u32 %s1570_s11, 4  ;;  %s917_s2 = int_to_ptr.hbm [resolvable:$true] %s916_s2 }
 0x1b9   :  { %v785_v5 = vpop.f32.mrf.mxu3 }
 0x1ba   :  { %v786_v6 = vadd.f32 %v1519_v49, %v785_v5 }
 0x1bc   :  { %v806_v9 = vmax.f32 %v786_v6, 0.0  ;;  %v452_v16 = vpop.f32.mrf.mxu1 }
 0x1bd   :  { %v453_v18 = vadd.f32 %v1514_v37, %v452_v16 }
 0x1be   :  { %v822_v10 = vmul.f32 %v806_v9, %v468_v8  ;;  %v897_v9 = vand.u32 127, %v896_v4 }
 0x1bf   :  { %v470_v21 = vmax.f32 %v453_v18, 0.0 }
 0x1c0   :  { %838 = vxpose.xlu0.b32.cont [14/16] %v822_v10, 128  ;;  %vm901_vm1 = vcmp.lt.s32.totalorder %v897_v9, 8 }
 0x1c1   :  { %v788_v12 = vpop.f32.mrf.mxu3 }
 0x1c2   :  { %v789_v13 = vadd.f32 %v1519_v49, %v788_v12 }
 0x1c4   :  { %v807_v15 = vmax.f32 %v789_v13, 0.0 }
 0x1c6   :  { %v823_v17 = vmul.f32 %v807_v15, %v469_v14 }
 0x1c8   :  { %839 = vxpose.xlu0.b32.cont [15/16] %v823_v17, 128 }
 0x1c9   :  { %v790_v19 = vpop.f32.mrf.mxu3 }
 0x1ca   :  { %v791_v20 = vadd.f32 %v1519_v49, %v790_v19 }
 0x1cc   :  { %v808_v22 = vmax.f32 %v791_v20, 0.0 }
 0x1ce   :  { %v824_v23 = vmul.f32 %v808_v22, %v470_v21 }
 0x1d0   :  { %840 = vxpose.xlu0.b32.end [16/16] %v824_v23, 128 }
 0x1fc   :  { %v841_v24 = vpop.trf.xlu0 }
 0x204   :  { %v842_v25 = vpop.trf.xlu0 }
 0x205   :  { %v857_v26 = vadd.f32 %v842_v25, %v841_v24 }
 0x20c   :  { %v843_v27 = vpop.trf.xlu0 }
 0x20d   :  { %v858_v28 = vadd.f32 %v857_v26, %v843_v27 }
 0x214   :  { %v844_v29 = vpop.trf.xlu0 }
 0x215   :  { %v859_v30 = vadd.f32 %v858_v28, %v844_v29 }
 0x21c   :  { %v845_v31 = vpop.trf.xlu0 }
 0x21d   :  { %v860_v32 = vadd.f32 %v859_v30, %v845_v31 }
 0x224   :  { %v846_v33 = vpop.trf.xlu0 }
 0x225   :  { %v861_v54 = vadd.f32 %v860_v32, %v846_v33 }
 0x22c   :  { %v847_v34 = vpop.trf.xlu0 }
 0x22d   :  { %v862_v40 = vadd.f32 %v861_v54, %v847_v34 }
 0x234   :  { %v848_v37 = vpop.trf.xlu0 }
 0x235   :  { %v863_v42 = vadd.f32 %v862_v40, %v848_v37 }
 0x23c   :  { %v849_v35 = vpop.trf.xlu0 }
 0x23d   :  { %v864_v43 = vadd.f32 %v863_v42, %v849_v35 }
 0x244   :  { %v850_v36 = vpop.trf.xlu0 }
 0x245   :  { %v865_v44 = vadd.f32 %v864_v43, %v850_v36 }
 0x24c   :  { %v851_v38 = vpop.trf.xlu0 }
 0x24d   :  { %v866_v45 = vadd.f32 %v865_v44, %v851_v38 }
 0x254   :  { %v852_v49 = vpop.trf.xlu0 }
 0x255   :  { %v867_v47 = vadd.f32 %v866_v45, %v852_v49 }
 0x25c   :  { %v853_v39 = vpop.trf.xlu0 }
 0x25d   :  { %v868_v48 = vadd.f32 %v867_v47, %v853_v39 }
 0x264   :  { %v854_v41 = vpop.trf.xlu0 }
 0x265   :  { %v869_v50 = vadd.f32 %v868_v48, %v854_v41 }
 0x26c   :  { %v855_v46 = vpop.trf.xlu0 }
 0x26d   :  { %v870_v51 = vadd.f32 %v869_v50, %v855_v46 }
 0x274   :  { %v856_v52 = vpop.trf.xlu0 }
 0x275   :  { %v871_v53 = vadd.f32 %v870_v51, %v856_v52 }
 0x277   :  { %v872_v55 = vrot.slane %v871_v53, 4 }
 0x279   :  { %v873_v56 = vadd.f32 %v872_v55, %v871_v53 }
 0x27b   :  { %v874_v57 = vrot.slane %v873_v56, 2 }
 0x27d   :  { %v875_v58 = vadd.f32 %v874_v57, %v873_v56 }
 0x27f   :  { %v876_v59 = vrot.slane %v875_v58, 1 }
 0x281   :  { %v877_v60 = vadd.f32 %v876_v59, %v875_v58 }
 0x283   :  { %v882_v61 = vand.u32 2147483647, %v877_v60  ;;  %v879_v6 = vmax.f32 %v877_v60, 0.0  ;;  %v880_v7 = vmul.f32 %v878_v3, %v877_v60 }
 0x285   :  { %v883_v62 = vsub.f32 0.0, %v882_v61  ;;  %v881_v13 = vsub.f32 %v879_v6, %v880_v7 }
 0x287   :  { %v884_v63 = vmul.f32 1.442695, %v883_v62 }
 0x289   :  { %1182 = vpow2.f32 %v884_v63 }
 0x28f   :  { %v1183_v0 = vpop.eup %1182 }
 0x290   :  { %v886_v1 = vadd.f32 1.0, %v1183_v0  ;;  %v889_v2 = vmul.f32 -0.5, %v1183_v0  ;;  %v892_v8 = vand.u32 2147483647, %v1183_v0 }
 0x292   :  { %1184 = vlog2.f32 %v886_v1  ;;  %v890_v5 = vadd.f32 1.0, %v889_v2  ;;  %vm893_vm0 = vcmp.lt.f32.partialorder %v892_v8, 0.0004427343 }
 0x294   :  { %v891_v12 = vmul.f32 %v1183_v0, %v890_v5 }
 0x298   :  { %v1185_v10 = vpop.eup %1184 }
 0x299   :  { %v888_v11 = vmul.f32 0.6931472, %v1185_v10 }
 0x29b   :  { %v894_v14 = vsel %vm893_vm0, %v891_v12, %v888_v11 }
 0x29c   :  { %v895_v15 = vadd.f32 %v894_v14, %v881_v13 }
 0x29e   :  { %v902_v16 = vsel %vm901_vm1, %v895_v15, 0.0 }
 0x29f   :  { %v904_v17 = vrot.slane %v902_v16, 7 }
 0x2a1   :  { %v907_v18 = vsel %vm906_vm2, %v877_v60, %v904_v17 }
 0x2a2   :  { %908 = vst [vmem:[#allocation13] sm:$0x3] %v907_v18 }
 0x2a3   :  { %919 = dma.vmem_to_hbm [thread:$0]  %s915_s1, 32, %s917_s2, [#allocation4]  }
 0x2a4   :  { %1362 = dma.done.wait [#allocation4], 32  }
 0x2a5   :  { %1363 = vsyncadd [#allocation4], 4294967264 }
 0x2a6   :  { %924 = vsyncpa [#allocation3], 1 }
 0x2a7   :  { %925 = vsyncpa [#allocation6], 1 }
 0x2a8   :  { %926 = vsyncpa [#allocation9], 1 }
 0x2a9   :  { %927 = vsyncpa [#allocation12], 1 }
 0x2aa   :  { %928 = vsyncpa [#allocation4], 1 }

// kernel: tpu_custom_call.1
= control target key start
LH: loop header
LB: loop body
LE: loop exit
PB: predicated region body
PF: predicated region fallthrough
CT: control target
= control target key end

     0   :  { %16 = vsyncpa [#allocation3], 0  ;;  %s1559_s0 = inlined_call_operand.hbm [shape: bf16[128,128], index: 0, kind: input, shape index: {}]   ;;  %s1560_s1 = inlined_call_operand.hbm [shape: bf16[128,128], index: 1, kind: input, shape index: {}]   ;;  %s1561_s2 = inlined_call_operand.vmem [shape: f32[1,1,128], index: 2, kind: input, shape index: {}]   ;;  %s1562_s3 = inlined_call_operand.hbm [shape: bf16[128,128], index: 3, kind: input, shape index: {}]   ;;  %s1563_s4 = inlined_call_operand.vmem [shape: f32[1,128], index: 4, kind: input, shape index: {}]   ;;  %s1564_s5 = inlined_call_operand.hbm [shape: bf16[128,128], index: 5, kind: input, shape index: {}]   ;;  %s1565_s6 = inlined_call_operand.vmem [shape: f32[1,128], index: 6, kind: input, shape index: {}]   ;;  %s1566_s7 = inlined_call_operand.hbm [shape: bf16[128,128], index: 7, kind: input, shape index: {}]   ;;  %s1567_s8 = inlined_call_operand.vmem [shape: f32[1,128], index: 8, kind: input, shape index: {}]   ;;  %s1568_s9 = inlined_call_operand.hbm [shape: bf16[128,128], index: 9, kind: input, shape index: {}]   ;;  %s1569_s10 = inlined_call_operand.vmem [shape: f32[1,128], index: 10, kind: input, shape index: {}]   ;;  %s1570_s11 = inlined_call_operand.hbm [shape: f32[1,2,128], index: 11, kind: output, shape index: {}]  }
   0x1   :  { %17 = vsyncpa [#allocation6], 0 }
   0x2   :  { %18 = vsyncpa [#allocation9], 0 }
   0x3   :  { %19 = vsyncpa [#allocation12], 0 }
   0x4   :  { %20 = vsyncpa [#allocation4], 0  ;;  %s38_s19 = sshll.u32 %s1560_s1, 4  ;;  %s1364_s20 = smov [#allocation5]   ;;  %s39_s19 = int_to_ptr.hbm [resolvable:$true] %s38_s19 }
   0x5   :  { %s40_s21 = sshll.u32 %s1364_s20, 4  ;;  %s68_s24 = sshll.u32 %s1564_s5, 4  ;;  %s41_s21 = int_to_ptr.vmem [resolvable:$true] %s40_s21  ;;  %s69_s24 = int_to_ptr.hbm [resolvable:$true] %s68_s24 }
   0x6   :  { %s1365_s25 = smov 64   ;;  %s1366_s26 = smov 4  }
   0x7   :  { %46 = dma.hbm_to_vmem [thread:$0]  %s39_s19, 1024, %s41_s21, [#allocation6], %s1365_s25, %s1365_s25, %s1366_s26  }
   0x8   :  { %s1367_s27 = smov [#allocation8]   ;;  %s25_s1 = sshll.u32 %s1559_s0, 4  ;;  %s26_s1 = int_to_ptr.hbm [resolvable:$true] %s25_s1 }
   0x9   :  { %s70_s28 = sshll.u32 %s1367_s27, 4  ;;  %s53_s13 = sshll.u32 %s1562_s3, 4  ;;  %s71_s28 = int_to_ptr.vmem [resolvable:$true] %s70_s28  ;;  %s54_s13 = int_to_ptr.hbm [resolvable:$true] %s53_s13 }
   0xa   :  { %76 = dma.hbm_to_vmem [thread:$0]  %s69_s24, 1024, %s71_s28, [#allocation9], %s1365_s25, %s1365_s25, %s1366_s26  }
   0xb   :  { %s1368_s14 = smov [#allocation2]   ;;  %s1369_s16 = smov [#allocation7]  }
   0xc   :  { %s27_s15 = sshll.u32 %s1368_s14, 4  ;;  %s55_s0 = sshll.u32 %s1369_s16, 4  ;;  %s28_s15 = int_to_ptr.vmem [resolvable:$true] %s27_s15  ;;  %s56_s0 = int_to_ptr.vmem [resolvable:$true] %s55_s0 }
   0xd   :  { %33 = dma.hbm_to_vmem [thread:$0]  %s26_s1, 1024, %s28_s15, [#allocation3], %s1365_s25, %s1365_s25, %s1366_s26  }
   0xe   :  { %s83_s19 = sshll.u32 %s1566_s7, 4  ;;  %s98_s21 = sshll.u32 %s1568_s9, 4  ;;  %s84_s19 = int_to_ptr.hbm [resolvable:$true] %s83_s19  ;;  %s99_s21 = int_to_ptr.hbm [resolvable:$true] %s98_s21 }
   0xf   :  { %61 = dma.hbm_to_vmem [thread:$0]  %s54_s13, 1024, %s56_s0, [#allocation6], %s1365_s25, %s1365_s25, %s1366_s26  }
  0x10   :  { %s1370_s22 = smov [#allocation10]   ;;  %s1371_s24 = smov [#allocation11]  }
  0x11   :  { %s85_s23 = sshll.u32 %s1370_s22, 4  ;;  %s100_s7 = sshll.u32 %s1371_s24, 4  ;;  %s86_s23 = int_to_ptr.vmem [resolvable:$true] %s85_s23  ;;  %s101_s7 = int_to_ptr.vmem [resolvable:$true] %s100_s7 }
  0x12   :  { %91 = dma.hbm_to_vmem [thread:$0]  %s84_s19, 1024, %s86_s23, [#allocation9], %s1365_s25, %s1365_s25, %s1366_s26  }
  0x13   :  { %106 = dma.hbm_to_vmem [thread:$0]  %s99_s21, 1024, %s101_s7, [#allocation12], %s1365_s25, %s1365_s25, %s1366_s26  }
  0x14   :  { %1354 = dma.done.wait [#allocation3], 1024  }
  0x15   :  { %1355 = vsyncadd [#allocation3], 4294966272 }
  0x16   :  { %1356 = dma.done.wait [#allocation6], 2048  }
  0x17   :  { %1357 = vsyncadd [#allocation6], 4294965248 }
  0x18   :  { %1358 = dma.done.wait [#allocation9], 2048  }
  0x19   :  { %1359 = vsyncadd [#allocation9], 4294965248 }
  0x1a   :  { %1360 = dma.done.wait [#allocation12], 1024  }
  0x1b   :  { %1361 = vsyncadd [#allocation12], 4294966272  ;;  %v1136_v0 = vld [vmem:[#allocation7 + $0x38] sm:$0xff]  ;;  %v1135_v2 = vld [vmem:[#allocation7 + $0x30] sm:$0xff]  ;;  %s1372_s30 = smov [#allocation13]   ;;  %vm906_vm2 = vcmask 1040384  }
  0x1c   :  { %v1160_v1 = vld [vmem:[#allocation10 + $0x38] sm:$0xff]  ;;  %265 = vmatpush.bf16.msra.mxu0 %v1136_v0  ;;  %v1159_v3 = vld [vmem:[#allocation10 + $0x30] sm:$0xff]  ;;  %v1134_v4 = vld [vmem:[#allocation7 + $0x28] sm:$0xff]  ;;  %s914_s1 = sshll.u32 %s1372_s30, 4  ;;  %s915_s1 = int_to_ptr.vmem [resolvable:$true] %s914_s1 }
  0x1d   :  { %603 = vmatpush.bf16.msra.mxu2 %v1160_v1  ;;  %v1158_v5 = vld [vmem:[#allocation10 + $0x28] sm:$0xff]  ;;  %v1133_v6 = vld [vmem:[#allocation7 + $0x20] sm:$0xff]  ;;  %v1132_v8 = vld [vmem:[#allocation7 + $0x18] sm:$0xff] }
  0x1e   :  { %v1157_v7 = vld [vmem:[#allocation10 + $0x20] sm:$0xff]  ;;  %v1156_v9 = vld [vmem:[#allocation10 + $0x18] sm:$0xff]  ;;  %v1131_v10 = vld [vmem:[#allocation7 + $0x10] sm:$0xff] }
  0x1f   :  { %v1155_v11 = vld [vmem:[#allocation10 + $0x10] sm:$0xff]  ;;  %v1130_v12 = vld [vmem:[#allocation7 + $0x8] sm:$0xff]  ;;  %v1129_v14 = vld [vmem:[#allocation7] sm:$0xff] }
  0x20   :  { %266 = vmatpush.bf16.msra.mxu0 %v1135_v2  ;;  %v1154_v13 = vld [vmem:[#allocation10 + $0x8] sm:$0xff]  ;;  %v1153_v15 = vld [vmem:[#allocation10] sm:$0xff]  ;;  %v1123_v20 = vld [vmem:[#allocation2 + $0x10] sm:$0xff] }
  0x21   :  { %604 = vmatpush.bf16.msra.mxu2 %v1159_v3  ;;  %v1121_v16 = vld [vmem:[#allocation2] sm:$0xff]  ;;  %v1122_v18 = vld [vmem:[#allocation2 + $0x8] sm:$0xff]  ;;  %v1147_v21 = vld [vmem:[#allocation5 + $0x10] sm:$0xff] }
  0x22   :  { %v1145_v17 = vld [vmem:[#allocation5] sm:$0xff]  ;;  %v1146_v19 = vld [vmem:[#allocation5 + $0x8] sm:$0xff]  ;;  %v1124_v22 = vld [vmem:[#allocation2 + $0x18] sm:$0xff] }
  0x23   :  { %v1148_v23 = vld [vmem:[#allocation5 + $0x18] sm:$0xff]  ;;  %v1125_v24 = vld [vmem:[#allocation2 + $0x20] sm:$0xff]  ;;  %v1126_v27 = vld [vmem:[#allocation2 + $0x28] sm:$0xff] }
  0x24   :  { %267 = vmatpush.bf16.msra.mxu0 %v1134_v4  ;;  %v1149_v25 = vld [vmem:[#allocation5 + $0x20] sm:$0xff]  ;;  %v1144_v26 = vld [vmem:[#allocation8 + $0x38] sm:$0xff]  ;;  %v1150_v28 = vld [vmem:[#allocation5 + $0x28] sm:$0xff] }
  0x25   :  { %605 = vmatpush.bf16.msra.mxu2 %v1158_v5  ;;  %406 = vmatpush.bf16.msra.mxu1 %v1144_v26  ;;  %v1143_v29 = vld [vmem:[#allocation8 + $0x30] sm:$0xff]  ;;  %v1168_v30 = vld [vmem:[#allocation11 + $0x38] sm:$0xff]  ;;  %v1142_v31 = vld [vmem:[#allocation8 + $0x28] sm:$0xff] }
  0x26   :  { %744 = vmatpush.bf16.msra.mxu3 %v1168_v30  ;;  %v1167_v32 = vld [vmem:[#allocation11 + $0x30] sm:$0xff]  ;;  %v1141_v33 = vld [vmem:[#allocation8 + $0x20] sm:$0xff]  ;;  %v1166_v34 = vld [vmem:[#allocation11 + $0x28] sm:$0xff] }
  0x27   :  { %v1140_v35 = vld [vmem:[#allocation8 + $0x18] sm:$0xff]  ;;  %v1127_v36 = vld [vmem:[#allocation2 + $0x30] sm:$0xff]  ;;  %v1165_v38 = vld [vmem:[#allocation11 + $0x20] sm:$0xff] }
  0x28   :  { %268 = vmatpush.bf16.msra.mxu0 %v1133_v6  ;;  %v1151_v37 = vld [vmem:[#allocation5 + $0x30] sm:$0xff]  ;;  %v1164_v40 = vld [vmem:[#allocation11 + $0x18] sm:$0xff]  ;;  %v1138_v41 = vld [vmem:[#allocation8 + $0x8] sm:$0xff] }
  0x29   :  { %606 = vmatpush.bf16.msra.mxu2 %v1157_v7  ;;  %407 = vmatpush.bf16.msra.mxu1 %v1143_v29  ;;  %v1139_v39 = vld [vmem:[#allocation8 + $0x10] sm:$0xff]  ;;  %v1137_v43 = vld [vmem:[#allocation8] sm:$0xff]  ;;  %v1162_v44 = vld [vmem:[#allocation11 + $0x8] sm:$0xff] }
  0x2a   :  { %745 = vmatpush.bf16.msra.mxu3 %v1167_v32  ;;  %v1163_v42 = vld [vmem:[#allocation11 + $0x10] sm:$0xff]  ;;  %v1128_v45 = vld [vmem:[#allocation2 + $0x38] sm:$0xff]  ;;  %v1161_v47 = vld [vmem:[#allocation11] sm:$0xff] }
  0x2b   :  { %v1152_v46 = vld [vmem:[#allocation5 + $0x38] sm:$0xff]  ;;  %v1472_v49 = vld [vmem:[%s1563_s4] ss:$0 sm:$0xff] }
  0x2c   :  { %269 = vmatpush.bf16.msra.mxu0 %v1132_v8  ;;  %v1478_v54 = vld [vmem:[%s1567_s8] ss:$0 sm:$0xff] }
  0x2d   :  { %607 = vmatpush.bf16.msra.mxu2 %v1156_v9  ;;  %408 = vmatpush.bf16.msra.mxu1 %v1142_v31 }
  0x2e   :  { %746 = vmatpush.bf16.msra.mxu3 %v1166_v34 }
  0x30   :  { %270 = vmatpush.bf16.msra.mxu0 %v1131_v10 }
  0x31   :  { %608 = vmatpush.bf16.msra.mxu2 %v1155_v11  ;;  %409 = vmatpush.bf16.msra.mxu1 %v1141_v33 }
  0x32   :  { %747 = vmatpush.bf16.msra.mxu3 %v1165_v38 }
  0x34   :  { %271 = vmatpush.bf16.msra.mxu0 %v1130_v12 }
  0x35   :  { %609 = vmatpush.bf16.msra.mxu2 %v1154_v13  ;;  %410 = vmatpush.bf16.msra.mxu1 %v1140_v35 }
  0x36   :  { %748 = vmatpush.bf16.msra.mxu3 %v1164_v40 }
  0x38   :  { %272 = vmatpush.bf16.msra.mxu0 %v1129_v14 }
  0x39   :  { %610 = vmatpush.bf16.msra.mxu2 %v1153_v15  ;;  %411 = vmatpush.bf16.msra.mxu1 %v1139_v39 }
  0x3a   :  { %749 = vmatpush.bf16.msra.mxu3 %v1163_v42 }
  0x3b   :  { %273 = vmatmul.bf16.vlgmr.msra.gmra.mxu0 %v1121_v16 }
  0x3c   :  { %611 = vmatmul.bf16.vlgmr.msra.gmra.mxu2 %v1145_v17 }
  0x3d   :  { %412 = vmatpush.bf16.msra.mxu1 %v1138_v41 }
  0x3e   :  { %750 = vmatpush.bf16.msra.mxu3 %v1162_v44 }
  0x41   :  { %413 = vmatpush.bf16.msra.mxu1 %v1137_v43 }
  0x42   :  { %751 = vmatpush.bf16.msra.mxu3 %v1161_v47 }
  0x4b   :  { %278 = vmatmul.bf16.gmra.mxu0 %v1122_v18 }
  0x4c   :  { %616 = vmatmul.bf16.gmra.mxu2 %v1146_v19 }
  0x5b   :  { %283 = vmatmul.bf16.gmra.mxu0 %v1123_v20 }
  0x5c   :  { %621 = vmatmul.bf16.gmra.mxu2 %v1147_v21 }
  0x6b   :  { %288 = vmatmul.bf16.gmra.mxu0 %v1124_v22 }
  0x6c   :  { %626 = vmatmul.bf16.gmra.mxu2 %v1148_v23 }
  0x7b   :  { %293 = vmatmul.bf16.gmra.mxu0 %v1125_v24 }
  0x7c   :  { %631 = vmatmul.bf16.gmra.mxu2 %v1149_v25 }
  0x8b   :  { %298 = vmatmul.bf16.gmra.mxu0 %v1126_v27 }
  0x8c   :  { %636 = vmatmul.bf16.gmra.mxu2 %v1150_v28 }
  0x9b   :  { %303 = vmatmul.bf16.gmra.mxu0 %v1127_v36 }
  0x9c   :  { %641 = vmatmul.bf16.gmra.mxu2 %v1151_v37 }
  0xab   :  { %308 = vmatmul.bf16.gmra.mxu0 %v1128_v45 }
  0xac   :  { %646 = vmatmul.bf16.gmra.mxu2 %v1152_v46 }
  0xb8   :  { %v274_v48 = vpop.f32.mrf.mxu0 }
  0xb9   :  { %v275_v50 = vadd.f32 %v1472_v49, %v274_v48 }
  0xbb   :  { %v314_v53 = vmax.f32 %v275_v50, 0.0 }
  0xbf   :  { %v612_v51 = vpop.f32.mrf.mxu2 }
  0xc0   :  { %v276_v52 = vpop.f32.mrf.mxu0  ;;  %v613_v57 = vadd.f32 %v1478_v54, %v612_v51 }
  0xc1   :  { %v277_v55 = vadd.f32 %v1472_v49, %v276_v52 }
  0xc2   :  { %v652_v62 = vmax.f32 %v613_v57, 0.0 }
  0xc3   :  { %v315_v56 = vmax.f32 %v277_v55, 0.0 }
  0xc5   :  { %v330_v58 = vpack.c.bf16 %v315_v56, %v314_v53 }
  0xc7   :  { %v614_v59 = vpop.f32.mrf.mxu2  ;;  %414 = vmatmul.bf16.vlgmr.msra.gmra.mxu1 %v330_v58 }
  0xc8   :  { %v615_v60 = vadd.f32 %v1478_v54, %v614_v59  ;;  %v279_v61 = vpop.f32.mrf.mxu0 }
  0xc9   :  { %v280_v1 = vadd.f32 %v1472_v49, %v279_v61 }
  0xca   :  { %v653_v63 = vmax.f32 %v615_v60, 0.0 }
  0xcb   :  { %v316_v4 = vmax.f32 %v280_v1, 0.0 }
  0xcc   :  { %v668_v0 = vpack.c.bf16 %v653_v63, %v652_v62 }
  0xce   :  { %752 = vmatmul.bf16.vlgmr.msra.gmra.mxu3 %v668_v0 }
  0xcf   :  { %v617_v2 = vpop.f32.mrf.mxu2 }
  0xd0   :  { %v281_v3 = vpop.f32.mrf.mxu0  ;;  %v618_v7 = vadd.f32 %v1478_v54, %v617_v2 }
  0xd1   :  { %v282_v5 = vadd.f32 %v1472_v49, %v281_v3 }
  0xd2   :  { %v654_v12 = vmax.f32 %v618_v7, 0.0 }
  0xd3   :  { %v317_v6 = vmax.f32 %v282_v5, 0.0 }
  0xd5   :  { %v331_v8 = vpack.c.bf16 %v317_v6, %v316_v4 }
  0xd7   :  { %v619_v9 = vpop.f32.mrf.mxu2  ;;  %419 = vmatmul.bf16.gmra.mxu1 %v331_v8 }
  0xd8   :  { %v620_v10 = vadd.f32 %v1478_v54, %v619_v9  ;;  %v284_v11 = vpop.f32.mrf.mxu0 }
  0xd9   :  { %v285_v15 = vadd.f32 %v1472_v49, %v284_v11 }
  0xda   :  { %v655_v13 = vmax.f32 %v620_v10, 0.0 }
  0xdb   :  { %v318_v18 = vmax.f32 %v285_v15, 0.0 }
  0xdc   :  { %v669_v14 = vpack.c.bf16 %v655_v13, %v654_v12 }
  0xde   :  { %757 = vmatmul.bf16.gmra.mxu3 %v669_v14 }
  0xdf   :  { %v622_v16 = vpop.f32.mrf.mxu2 }
  0xe0   :  { %v286_v17 = vpop.f32.mrf.mxu0  ;;  %v623_v21 = vadd.f32 %v1478_v54, %v622_v16 }
  0xe1   :  { %v287_v19 = vadd.f32 %v1472_v49, %v286_v17 }
  0xe2   :  { %v656_v26 = vmax.f32 %v623_v21, 0.0 }
  0xe3   :  { %v319_v20 = vmax.f32 %v287_v19, 0.0 }
  0xe5   :  { %v332_v22 = vpack.c.bf16 %v319_v20, %v318_v18 }
  0xe7   :  { %v624_v23 = vpop.f32.mrf.mxu2  ;;  %424 = vmatmul.bf16.gmra.mxu1 %v332_v22 }
  0xe8   :  { %v625_v24 = vadd.f32 %v1478_v54, %v624_v23  ;;  %v289_v25 = vpop.f32.mrf.mxu0 }
  0xe9   :  { %v290_v29 = vadd.f32 %v1472_v49, %v289_v25 }
  0xea   :  { %v657_v27 = vmax.f32 %v625_v24, 0.0 }
  0xeb   :  { %v320_v32 = vmax.f32 %v290_v29, 0.0 }
  0xec   :  { %v670_v28 = vpack.c.bf16 %v657_v27, %v656_v26 }
  0xee   :  { %762 = vmatmul.bf16.gmra.mxu3 %v670_v28 }
  0xef   :  { %v627_v30 = vpop.f32.mrf.mxu2 }
  0xf0   :  { %v291_v31 = vpop.f32.mrf.mxu0  ;;  %v628_v35 = vadd.f32 %v1478_v54, %v627_v30 }
  0xf1   :  { %v292_v33 = vadd.f32 %v1472_v49, %v291_v31 }
  0xf2   :  { %v658_v40 = vmax.f32 %v628_v35, 0.0 }
  0xf3   :  { %v321_v34 = vmax.f32 %v292_v33, 0.0 }
  0xf5   :  { %v333_v36 = vpack.c.bf16 %v321_v34, %v320_v32 }
  0xf7   :  { %v629_v37 = vpop.f32.mrf.mxu2  ;;  %429 = vmatmul.bf16.gmra.mxu1 %v333_v36 }
  0xf8   :  { %v630_v38 = vadd.f32 %v1478_v54, %v629_v37  ;;  %v294_v39 = vpop.f32.mrf.mxu0  ;;  %v1514_v37 = vld [vmem:[%s1565_s6] ss:$0 sm:$0xff] }
  0xf9   :  { %v295_v43 = vadd.f32 %v1472_v49, %v294_v39 }
  0xfa   :  { %v659_v41 = vmax.f32 %v630_v38, 0.0 }
  0xfb   :  { %v322_v46 = vmax.f32 %v295_v43, 0.0 }
  0xfc   :  { %v671_v42 = vpack.c.bf16 %v659_v41, %v658_v40 }
  0xfe   :  { %767 = vmatmul.bf16.gmra.mxu3 %v671_v42 }
  0xff   :  { %v632_v44 = vpop.f32.mrf.mxu2 }
 0x100   :  { %v296_v45 = vpop.f32.mrf.mxu0  ;;  %v633_v50 = vadd.f32 %v1478_v54, %v632_v44 }
 0x101   :  { %v297_v47 = vadd.f32 %v1472_v49, %v296_v45 }
 0x102   :  { %v660_v56 = vmax.f32 %v633_v50, 0.0 }
 0x103   :  { %v323_v48 = vmax.f32 %v297_v47, 0.0 }
 0x105   :  { %v334_v51 = vpack.c.bf16 %v323_v48, %v322_v46 }
 0x107   :  { %v634_v52 = vpop.f32.mrf.mxu2  ;;  %434 = vmatmul.bf16.gmra.mxu1 %v334_v51 }
 0x108   :  { %v635_v53 = vadd.f32 %v1478_v54, %v634_v52  ;;  %v299_v55 = vpop.f32.mrf.mxu0 }
 0x109   :  { %v300_v59 = vadd.f32 %v1472_v49, %v299_v55 }
 0x10a   :  { %v661_v57 = vmax.f32 %v635_v53, 0.0 }
 0x10b   :  { %v324_v62 = vmax.f32 %v300_v59, 0.0 }
 0x10c   :  { %v672_v58 = vpack.c.bf16 %v661_v57, %v660_v56 }
 0x10e   :  { %772 = vmatmul.bf16.gmra.mxu3 %v672_v58 }
 0x10f   :  { %v637_v60 = vpop.f32.mrf.mxu2 }
 0x110   :  { %v301_v61 = vpop.f32.mrf.mxu0  ;;  %v638_v1 = vadd.f32 %v1478_v54, %v637_v60 }
 0x111   :  { %v302_v63 = vadd.f32 %v1472_v49, %v301_v61 }
 0x112   :  { %v662_v6 = vmax.f32 %v638_v1, 0.0 }
 0x113   :  { %v325_v0 = vmax.f32 %v302_v63, 0.0 }
 0x115   :  { %v335_v2 = vpack.c.bf16 %v325_v0, %v324_v62 }
 0x117   :  { %v639_v3 = vpop.f32.mrf.mxu2  ;;  %439 = vmatmul.bf16.gmra.mxu1 %v335_v2 }
 0x118   :  { %v640_v4 = vadd.f32 %v1478_v54, %v639_v3  ;;  %v304_v5 = vpop.f32.mrf.mxu0 }
 0x119   :  { %v305_v9 = vadd.f32 %v1472_v49, %v304_v5 }
 0x11a   :  { %v663_v7 = vmax.f32 %v640_v4, 0.0 }
 0x11b   :  { %v326_v12 = vmax.f32 %v305_v9, 0.0 }
 0x11c   :  { %v673_v8 = vpack.c.bf16 %v663_v7, %v662_v6 }
 0x11e   :  { %777 = vmatmul.bf16.gmra.mxu3 %v673_v8 }
 0x11f   :  { %v642_v10 = vpop.f32.mrf.mxu2 }
 0x120   :  { %v306_v11 = vpop.f32.mrf.mxu0  ;;  %v643_v15 = vadd.f32 %v1478_v54, %v642_v10 }
 0x121   :  { %v307_v13 = vadd.f32 %v1472_v49, %v306_v11 }
 0x122   :  { %v664_v20 = vmax.f32 %v643_v15, 0.0 }
 0x123   :  { %v327_v14 = vmax.f32 %v307_v13, 0.0 }
 0x125   :  { %v336_v16 = vpack.c.bf16 %v327_v14, %v326_v12 }
 0x127   :  { %v644_v17 = vpop.f32.mrf.mxu2  ;;  %444 = vmatmul.bf16.gmra.mxu1 %v336_v16 }
 0x128   :  { %v645_v18 = vadd.f32 %v1478_v54, %v644_v17  ;;  %v309_v19 = vpop.f32.mrf.mxu0 }
 0x129   :  { %v310_v23 = vadd.f32 %v1472_v49, %v309_v19 }
 0x12a   :  { %v665_v21 = vmax.f32 %v645_v18, 0.0 }
 0x12b   :  { %v328_v26 = vmax.f32 %v310_v23, 0.0 }
 0x12c   :  { %v674_v22 = vpack.c.bf16 %v665_v21, %v664_v20 }
 0x12e   :  { %782 = vmatmul.bf16.gmra.mxu3 %v674_v22 }
 0x12f   :  { %v647_v24 = vpop.f32.mrf.mxu2 }
 0x130   :  { %v311_v25 = vpop.f32.mrf.mxu0  ;;  %v648_v29 = vadd.f32 %v1478_v54, %v647_v24 }
 0x131   :  { %v312_v27 = vadd.f32 %v1472_v49, %v311_v25  ;;  %v1519_v49 = vld [vmem:[%s1569_s10] ss:$0 sm:$0xff] }
 0x132   :  { %v666_v33 = vmax.f32 %v648_v29, 0.0 }
 0x133   :  { %v329_v28 = vmax.f32 %v312_v27, 0.0 }
 0x135   :  { %v337_v30 = vpack.c.bf16 %v329_v28, %v328_v26 }
 0x137   :  { %v649_v31 = vpop.f32.mrf.mxu2  ;;  %449 = vmatmul.bf16.gmra.mxu1 %v337_v30 }
 0x138   :  { %v650_v32 = vadd.f32 %v1478_v54, %v649_v31 }
 0x13a   :  { %v667_v34 = vmax.f32 %v650_v32, 0.0 }
 0x13c   :  { %v675_v35 = vpack.c.bf16 %v667_v34, %v666_v33 }
 0x13e   :  { %787 = vmatmul.bf16.gmra.mxu3 %v675_v35 }
 0x144   :  { %v415_v36 = vpop.f32.mrf.mxu1 }
 0x145   :  { %v416_v39 = vadd.f32 %v1514_v37, %v415_v36 }
 0x147   :  { %v455_v41 = vmax.f32 %v416_v39, 0.0 }
 0x14c   :  { %v417_v38 = vpop.f32.mrf.mxu1 }
 0x14d   :  { %v418_v45 = vadd.f32 %v1514_v37, %v417_v38 }
 0x14f   :  { %v456_v48 = vmax.f32 %v418_v45, 0.0 }
 0x151   :  { %v753_v54 = vpop.f32.mrf.mxu3 }
 0x152   :  { %v754_v40 = vadd.f32 %v1519_v49, %v753_v54 }
 0x154   :  { %v793_v42 = vmax.f32 %v754_v40, 0.0  ;;  %v420_v43 = vpop.f32.mrf.mxu1 }
 0x155   :  { %v421_v53 = vadd.f32 %v1514_v37, %v420_v43 }
 0x156   :  { %v809_v44 = vmul.f32 %v793_v42, %v455_v41 }
 0x157   :  { %v457_v57 = vmax.f32 %v421_v53, 0.0 }
 0x158   :  { %825 = vxpose.xlu0.b32.start [1/16] %v809_v44, 128 }
 0x159   :  { %v755_v46 = vpop.f32.mrf.mxu3 }
 0x15a   :  { %v756_v47 = vadd.f32 %v1519_v49, %v755_v46 }
 0x15c   :  { %v794_v50 = vmax.f32 %v756_v47, 0.0  ;;  %v422_v51 = vpop.f32.mrf.mxu1 }
 0x15d   :  { %v423_v61 = vadd.f32 %v1514_v37, %v422_v51 }
 0x15e   :  { %v810_v52 = vmul.f32 %v794_v50, %v456_v48 }
 0x15f   :  { %v458_v0 = vmax.f32 %v423_v61, 0.0 }
 0x160   :  { %826 = vxpose.xlu0.b32.cont [2/16] %v810_v52, 128 }
 0x161   :  { %v758_v55 = vpop.f32.mrf.mxu3 }
 0x162   :  { %v759_v56 = vadd.f32 %v1519_v49, %v758_v55 }
 0x164   :  { %v795_v58 = vmax.f32 %v759_v56, 0.0  ;;  %v425_v59 = vpop.f32.mrf.mxu1 }
 0x165   :  { %v426_v4 = vadd.f32 %v1514_v37, %v425_v59 }
 0x166   :  { %v811_v60 = vmul.f32 %v795_v58, %v457_v57 }
 0x167   :  { %v459_v7 = vmax.f32 %v426_v4, 0.0 }
 0x168   :  { %827 = vxpose.xlu0.b32.cont [3/16] %v811_v60, 128 }
 0x169   :  { %v760_v62 = vpop.f32.mrf.mxu3 }
 0x16a   :  { %v761_v63 = vadd.f32 %v1519_v49, %v760_v62 }
 0x16c   :  { %v796_v1 = vmax.f32 %v761_v63, 0.0  ;;  %v427_v2 = vpop.f32.mrf.mxu1 }
 0x16d   :  { %v428_v11 = vadd.f32 %v1514_v37, %v427_v2 }
 0x16e   :  { %v812_v3 = vmul.f32 %v796_v1, %v458_v0 }
 0x16f   :  { %v460_v14 = vmax.f32 %v428_v11, 0.0 }
 0x170   :  { %828 = vxpose.xlu0.b32.cont [4/16] %v812_v3, 128 }
 0x171   :  { %v763_v5 = vpop.f32.mrf.mxu3 }
 0x172   :  { %v764_v6 = vadd.f32 %v1519_v49, %v763_v5 }
 0x174   :  { %v797_v8 = vmax.f32 %v764_v6, 0.0  ;;  %v430_v9 = vpop.f32.mrf.mxu1 }
 0x175   :  { %v431_v18 = vadd.f32 %v1514_v37, %v430_v9 }
 0x176   :  { %v813_v10 = vmul.f32 %v797_v8, %v459_v7 }
 0x177   :  { %v461_v21 = vmax.f32 %v431_v18, 0.0 }
 0x178   :  { %829 = vxpose.xlu0.b32.cont [5/16] %v813_v10, 128 }
 0x179   :  { %v765_v12 = vpop.f32.mrf.mxu3 }
 0x17a   :  { %v766_v13 = vadd.f32 %v1519_v49, %v765_v12 }
 0x17c   :  { %v798_v15 = vmax.f32 %v766_v13, 0.0  ;;  %v432_v16 = vpop.f32.mrf.mxu1 }
 0x17d   :  { %v433_v25 = vadd.f32 %v1514_v37, %v432_v16 }
 0x17e   :  { %v814_v17 = vmul.f32 %v798_v15, %v460_v14 }
 0x17f   :  { %v462_v28 = vmax.f32 %v433_v25, 0.0 }
 0x180   :  { %830 = vxpose.xlu0.b32.cont [6/16] %v814_v17, 128 }
 0x181   :  { %v768_v19 = vpop.f32.mrf.mxu3 }
 0x182   :  { %v769_v20 = vadd.f32 %v1519_v49, %v768_v19 }
 0x184   :  { %v799_v22 = vmax.f32 %v769_v20, 0.0  ;;  %v435_v23 = vpop.f32.mrf.mxu1 }
 0x185   :  { %v436_v32 = vadd.f32 %v1514_v37, %v435_v23 }
 0x186   :  { %v815_v24 = vmul.f32 %v799_v22, %v461_v21 }
 0x187   :  { %v463_v35 = vmax.f32 %v436_v32, 0.0 }
 0x188   :  { %831 = vxpose.xlu0.b32.cont [7/16] %v815_v24, 128 }
 0x189   :  { %v770_v26 = vpop.f32.mrf.mxu3 }
 0x18a   :  { %v771_v27 = vadd.f32 %v1519_v49, %v770_v26 }
 0x18c   :  { %v800_v29 = vmax.f32 %v771_v27, 0.0  ;;  %v437_v30 = vpop.f32.mrf.mxu1 }
 0x18d   :  { %v438_v54 = vadd.f32 %v1514_v37, %v437_v30 }
 0x18e   :  { %v816_v31 = vmul.f32 %v800_v29, %v462_v28 }
 0x18f   :  { %v464_v42 = vmax.f32 %v438_v54, 0.0 }
 0x190   :  { %832 = vxpose.xlu0.b32.cont [8/16] %v816_v31, 128 }
 0x191   :  { %v773_v33 = vpop.f32.mrf.mxu3 }
 0x192   :  { %v774_v34 = vadd.f32 %v1519_v49, %v773_v33 }
 0x194   :  { %v801_v36 = vmax.f32 %v774_v34, 0.0  ;;  %v440_v38 = vpop.f32.mrf.mxu1 }
 0x195   :  { %v441_v46 = vadd.f32 %v1514_v37, %v440_v38 }
 0x196   :  { %v817_v39 = vmul.f32 %v801_v36, %v463_v35 }
 0x197   :  { %v465_v50 = vmax.f32 %v441_v46, 0.0 }
 0x198   :  { %833 = vxpose.xlu0.b32.cont [9/16] %v817_v39, 128 }
 0x199   :  { %v775_v40 = vpop.f32.mrf.mxu3 }
 0x19a   :  { %v776_v41 = vadd.f32 %v1519_v49, %v775_v40 }
 0x19c   :  { %v802_v43 = vmax.f32 %v776_v41, 0.0  ;;  %v442_v44 = vpop.f32.mrf.mxu1 }
 0x19d   :  { %v443_v55 = vadd.f32 %v1514_v37, %v442_v44 }
 0x19e   :  { %v818_v45 = vmul.f32 %v802_v43, %v464_v42 }
 0x19f   :  { %v466_v58 = vmax.f32 %v443_v55, 0.0 }
 0x1a0   :  { %834 = vxpose.xlu0.b32.cont [10/16] %v818_v45, 128 }
 0x1a1   :  { %v778_v47 = vpop.f32.mrf.mxu3 }
 0x1a2   :  { %v779_v48 = vadd.f32 %v1519_v49, %v778_v47 }
 0x1a4   :  { %v803_v51 = vmax.f32 %v779_v48, 0.0  ;;  %v445_v53 = vpop.f32.mrf.mxu1 }
 0x1a5   :  { %v446_v61 = vadd.f32 %v1514_v37, %v445_v53 }
 0x1a6   :  { %v819_v52 = vmul.f32 %v803_v51, %v465_v50 }
 0x1a7   :  { %v467_v1 = vmax.f32 %v446_v61, 0.0 }
 0x1a8   :  { %835 = vxpose.xlu0.b32.cont [11/16] %v819_v52, 128 }
 0x1a9   :  { %v780_v56 = vpop.f32.mrf.mxu3 }
 0x1aa   :  { %v781_v57 = vadd.f32 %v1519_v49, %v780_v56 }
 0x1ac   :  { %v804_v59 = vmax.f32 %v781_v57, 0.0  ;;  %v447_v62 = vpop.f32.mrf.mxu1 }
 0x1ad   :  { %v448_v4 = vadd.f32 %v1514_v37, %v447_v62 }
 0x1ae   :  { %v820_v60 = vmul.f32 %v804_v59, %v466_v58 }
 0x1af   :  { %v468_v8 = vmax.f32 %v448_v4, 0.0  ;;  %v896_v4 = vlaneseq }
 0x1b0   :  { %836 = vxpose.xlu0.b32.cont [12/16] %v820_v60, 128 }
 0x1b1   :  { %v783_v63 = vpop.f32.mrf.mxu3 }
 0x1b2   :  { %v784_v0 = vadd.f32 %v1519_v49, %v783_v63 }
 0x1b4   :  { %v805_v2 = vmax.f32 %v784_v0, 0.0  ;;  %v450_v7 = vpop.f32.mrf.mxu1 }
 0x1b5   :  { %v451_v11 = vadd.f32 %v1514_v37, %v450_v7 }
 0x1b6   :  { %v821_v3 = vmul.f32 %v805_v2, %v467_v1 }
 0x1b7   :  { %v469_v14 = vmax.f32 %v451_v11, 0.0 }
 0x1b8   :  { %837 = vxpose.xlu0.b32.cont [13/16] %v821_v3, 128  ;;  %v878_v3 = vld [vmem:[%s1561_s2] sm:$0x1]  ;;  %s916_s2 = sshll.u32 %s1570_s11, 4  ;;  %s917_s2 = int_to_ptr.hbm [resolvable:$true] %s916_s2 }
 0x1b9   :  { %v785_v5 = vpop.f32.mrf.mxu3 }
 0x1ba   :  { %v786_v6 = vadd.f32 %v1519_v49, %v785_v5 }
 0x1bc   :  { %v806_v9 = vmax.f32 %v786_v6, 0.0  ;;  %v452_v16 = vpop.f32.mrf.mxu1 }
 0x1bd   :  { %v453_v18 = vadd.f32 %v1514_v37, %v452_v16 }
 0x1be   :  { %v822_v10 = vmul.f32 %v806_v9, %v468_v8  ;;  %v897_v9 = vand.u32 127, %v896_v4 }
 0x1bf   :  { %v470_v21 = vmax.f32 %v453_v18, 0.0 }
 0x1c0   :  { %838 = vxpose.xlu0.b32.cont [14/16] %v822_v10, 128  ;;  %vm901_vm1 = vcmp.lt.s32.totalorder %v897_v9, 8 }
 0x1c1   :  { %v788_v12 = vpop.f32.mrf.mxu3 }
 0x1c2   :  { %v789_v13 = vadd.f32 %v1519_v49, %v788_v12 }
 0x1c4   :  { %v807_v15 = vmax.f32 %v789_v13, 0.0 }
 0x1c6   :  { %v823_v17 = vmul.f32 %v807_v15, %v469_v14 }
 0x1c8   :  { %839 = vxpose.xlu0.b32.cont [15/16] %v823_v17, 128 }
 0x1c9   :  { %v790_v19 = vpop.f32.mrf.mxu3 }
 0x1ca   :  { %v791_v20 = vadd.f32 %v1519_v49, %v790_v19 }
 0x1cc   :  { %v808_v22 = vmax.f32 %v791_v20, 0.0 }
 0x1ce   :  { %v824_v23 = vmul.f32 %v808_v22, %v470_v21 }
 0x1d0   :  { %840 = vxpose.xlu0.b32.end [16/16] %v824_v23, 128 }
 0x1fc   :  { %v841_v24 = vpop.trf.xlu0 }
 0x204   :  { %v842_v25 = vpop.trf.xlu0 }
 0x205   :  { %v857_v26 = vadd.f32 %v842_v25, %v841_v24 }
 0x20c   :  { %v843_v27 = vpop.trf.xlu0 }
 0x20d   :  { %v858_v28 = vadd.f32 %v857_v26, %v843_v27 }
 0x214   :  { %v844_v29 = vpop.trf.xlu0 }
 0x215   :  { %v859_v30 = vadd.f32 %v858_v28, %v844_v29 }
 0x21c   :  { %v845_v31 = vpop.trf.xlu0 }
 0x21d   :  { %v860_v32 = vadd.f32 %v859_v30, %v845_v31 }
 0x224   :  { %v846_v33 = vpop.trf.xlu0 }
 0x225   :  { %v861_v54 = vadd.f32 %v860_v32, %v846_v33 }
 0x22c   :  { %v847_v34 = vpop.trf.xlu0 }
 0x22d   :  { %v862_v40 = vadd.f32 %v861_v54, %v847_v34 }
 0x234   :  { %v848_v37 = vpop.trf.xlu0 }
 0x235   :  { %v863_v42 = vadd.f32 %v862_v40, %v848_v37 }
 0x23c   :  { %v849_v35 = vpop.trf.xlu0 }
 0x23d   :  { %v864_v43 = vadd.f32 %v863_v42, %v849_v35 }
 0x244   :  { %v850_v36 = vpop.trf.xlu0 }
 0x245   :  { %v865_v44 = vadd.f32 %v864_v43, %v850_v36 }
 0x24c   :  { %v851_v38 = vpop.trf.xlu0 }
 0x24d   :  { %v866_v45 = vadd.f32 %v865_v44, %v851_v38 }
 0x254   :  { %v852_v49 = vpop.trf.xlu0 }
 0x255   :  { %v867_v47 = vadd.f32 %v866_v45, %v852_v49 }
 0x25c   :  { %v853_v39 = vpop.trf.xlu0 }
 0x25d   :  { %v868_v48 = vadd.f32 %v867_v47, %v853_v39 }
 0x264   :  { %v854_v41 = vpop.trf.xlu0 }
 0x265   :  { %v869_v50 = vadd.f32 %v868_v48, %v854_v41 }
 0x26c   :  { %v855_v46 = vpop.trf.xlu0 }
 0x26d   :  { %v870_v51 = vadd.f32 %v869_v50, %v855_v46 }
 0x274   :  { %v856_v52 = vpop.trf.xlu0 }
 0x275   :  { %v871_v53 = vadd.f32 %v870_v51, %v856_v52 }
 0x277   :  { %v872_v55 = vrot.slane %v871_v53, 4 }
 0x279   :  { %v873_v56 = vadd.f32 %v872_v55, %v871_v53 }
 0x27b   :  { %v874_v57 = vrot.slane %v873_v56, 2 }
 0x27d   :  { %v875_v58 = vadd.f32 %v874_v57, %v873_v56 }
 0x27f   :  { %v876_v59 = vrot.slane %v875_v58, 1 }
 0x281   :  { %v877_v60 = vadd.f32 %v876_v59, %v875_v58 }
 0x283   :  { %v882_v61 = vand.u32 2147483647, %v877_v60  ;;  %v879_v6 = vmax.f32 %v877_v60, 0.0  ;;  %v880_v7 = vmul.f32 %v878_v3, %v877_v60 }
 0x285   :  { %v883_v62 = vsub.f32 0.0, %v882_v61  ;;  %v881_v13 = vsub.f32 %v879_v6, %v880_v7 }
 0x287   :  { %v884_v63 = vmul.f32 1.442695, %v883_v62 }
 0x289   :  { %1182 = vpow2.f32 %v884_v63 }
 0x28f   :  { %v1183_v0 = vpop.eup %1182 }
 0x290   :  { %v886_v1 = vadd.f32 1.0, %v1183_v0  ;;  %v889_v2 = vmul.f32 -0.5, %v1183_v0  ;;  %v892_v8 = vand.u32 2147483647, %v1183_v0 }
 0x292   :  { %1184 = vlog2.f32 %v886_v1  ;;  %v890_v5 = vadd.f32 1.0, %v889_v2  ;;  %vm893_vm0 = vcmp.lt.f32.partialorder %v892_v8, 0.0004427343 }
 0x294   :  { %v891_v12 = vmul.f32 %v1183_v0, %v890_v5 }
 0x298   :  { %v1185_v10 = vpop.eup %1184 }
 0x299   :  { %v888_v11 = vmul.f32 0.6931472, %v1185_v10 }
 0x29b   :  { %v894_v14 = vsel %vm893_vm0, %v891_v12, %v888_v11 }
 0x29c   :  { %v895_v15 = vadd.f32 %v894_v14, %v881_v13 }
 0x29e   :  { %v902_v16 = vsel %vm901_vm1, %v895_v15, 0.0 }
 0x29f   :  { %v904_v17 = vrot.slane %v902_v16, 7 }
 0x2a1   :  { %v907_v18 = vsel %vm906_vm2, %v877_v60, %v904_v17 }
 0x2a2   :  { %908 = vst [vmem:[#allocation13] sm:$0x3] %v907_v18 }
 0x2a3   :  { %919 = dma.vmem_to_hbm [thread:$0]  %s915_s1, 32, %s917_s2, [#allocation4]  }
 0x2a4   :  { %1362 = dma.done.wait [#allocation4], 32  }
 0x2a5   :  { %1363 = vsyncadd [#allocation4], 4294967264 }
 0x2a6   :  { %924 = vsyncpa [#allocation3], 1 }
 0x2a7   :  { %925 = vsyncpa [#allocation6], 1 }
 0x2a8   :  { %926 = vsyncpa [#allocation9], 1 }
 0x2a9   :  { %927 = vsyncpa [#allocation12], 1 }
 0x2aa   :  { %928 = vsyncpa [#allocation4], 1 }

</bundles_post_ra>
